<compile_context>
chip_gen: v7x
topology: tpu7x:2x2x1
jax: 0.10.0
libtpu: 0.0.40
codegen_flags: <defaults>
</compile_context>

<pallas_src>
import math

import jax
import jax.numpy as jnp
from jax import lax
from jax.experimental import pallas as pl
from jax.experimental.pallas import tpu as pltpu


def _milstm_recurrent_kernel(gin_ref, whh_ref, wa_ref, ba_ref, out_ref, h_scr, c_scr):
    """One grid step: `time_block` timesteps of the MI-LSTM recurrence for one batch block.

    gin_ref : (TT, TB, 6H) f32   precomputed [x@w_ih^T | x_p@w_ih_p^T] + fused biases
    whh_ref : (H, 6H)      bf16  fused [w_hh^T | w_hh_p^T]
    wa_ref  : (1, H)       f32
    ba_ref  : (1, 1)       f32   (SMEM scalar)
    out_ref : (TT, TB, H)  f32
    h_scr, c_scr : (TB, H) f32   recurrent state carried across time grid steps
    """
    TT = gin_ref.shape[0]
    H = h_scr.shape[-1]

    # initHidden(): zero state at the first time block of every batch block.
    @pl.when(pl.program_id(1) == 0)
    def _():
        h_scr[...] = jnp.zeros_like(h_scr)
        c_scr[...] = jnp.zeros_like(c_scr)

    whh = whh_ref[...]          # (H, 6H) bf16; block index is constant -> fetched once
    wa = wa_ref[...]            # (1, H)
    ba = ba_ref[0, 0]           # scalar from SMEM

    def step(tt, carry):
        hx, cx = carry                                       # (TB, H) f32
        # Single fused recurrent matmul on the MXU: bf16 operands, f32 accumulation.
        rec = jnp.dot(hx.astype(jnp.bfloat16), whh,
                      preferred_element_type=jnp.float32)    # (TB, 6H)
        gates = gin_ref[tt] + rec                            # (TB, 6H) f32

        ingate = jax.nn.sigmoid(gates[:, 0 * H:1 * H])
        forgetgate = jax.nn.sigmoid(gates[:, 1 * H:2 * H])
        cellgate = jnp.tanh(gates[:, 2 * H:3 * H])
        outgate = jax.nn.sigmoid(gates[:, 3 * H:4 * H])
        ingate_p = jax.nn.sigmoid(gates[:, 4 * H:5 * H])
        cellgate_p = jnp.tanh(gates[:, 5 * H:6 * H])

        l = ingate * cellgate                                # (TB, H)
        l_p = ingate_p * cellgate_p                          # (TB, H)

        # u = tanh(l @ w_a^T + b_a): w_a is (1, H) -> lane reduction on the XLU.
        u = jnp.tanh(jnp.sum(l * wa, axis=-1, keepdims=True) + ba)      # (TB, 1)
        u_p = jnp.tanh(jnp.sum(l_p * wa, axis=-1, keepdims=True) + ba)  # (TB, 1)

        # softmax over the two attention logits + bmm == convex combination of l, l_p.
        m = jnp.maximum(u, u_p)
        e = jnp.exp(u - m)
        e_p = jnp.exp(u_p - m)
        inv_denom = pl.reciprocal(e + e_p, approx=True)      # EUP slot, effectively free
        L = (e * inv_denom) * l + (e_p * inv_denom) * l_p

        cy = forgetgate * cx + L                             # f32 state update
        hy = outgate * jnp.tanh(cy)

        out_ref[tt] = hy.astype(out_ref.dtype)
        return hy, cy

    h, c = lax.fori_loop(0, TT, step, (h_scr[...], c_scr[...]), unroll=True)
    h_scr[...] = h
    c_scr[...] = c


def milstm_chain_forward(x, x_p, params, *, time_block=None, batch_block=None):
    """x, x_p: (B, T, H) float32. Returns (B, T, H) matching torch.cat(output,0).view(B,T,H)."""
    B, T, H = x.shape

    if time_block is None:
        time_block = next((c for c in (32, 16, 8, 4, 2, 1) if T % c == 0), 1)
        time_block = min(time_block, T)
    if batch_block is None:
        batch_block = B
    assert T % time_block == 0 and B % batch_block == 0
    TT, TB = time_block, batch_block

    # ---- Hoisted, non-sequential input projections: one big GEMM per input weight over
    # all timesteps, with biases pre-summed and folded in.
    xx = x.reshape(B * T, H)
    xxp = x_p.reshape(B * T, H)
    gin = jnp.dot(xx, params["w_ih"].T, preferred_element_type=jnp.float32)       # (B*T, 4H)
    gin_p = jnp.dot(xxp, params["w_ih_p"].T, preferred_element_type=jnp.float32)  # (B*T, 2H)
    bias = jnp.concatenate([params["b_ih"] + params["b_hh"],
                            params["b_ih_p"] + params["b_hh_p"]])                 # (6H,)
    gates_in = jnp.concatenate([gin, gin_p], axis=-1) + bias                      # (B*T, 6H)
    gates_in = jnp.transpose(gates_in.reshape(B, T, 6 * H), (1, 0, 2))            # (T, B, 6H)

    # ---- Fused recurrent weight [w_hh^T | w_hh_p^T], bf16 for the MXU.
    whh_fused = jnp.concatenate([params["w_hh"].T, params["w_hh_p"].T],
                                axis=1).astype(jnp.bfloat16)                      # (H, 6H)
    w_a = params["w_a"].astype(jnp.float32)                                       # (1, H)
    b_a = params["b_a"].reshape(1, 1).astype(jnp.float32)                         # SMEM scalar

    grid = (B // TB, T // TT)

    out_tbh = pl.pallas_call(
        _milstm_recurrent_kernel,
        out_shape=jax.ShapeDtypeStruct((T, B, H), x.dtype),
        grid_spec=pltpu.PrefetchScalarGridSpec(
            num_scalar_prefetch=0,
            grid=grid,
            in_specs=[
                pl.BlockSpec((TT, TB, 6 * H), lambda b, t: (t, b, 0)),  # precomputed gates
                pl.BlockSpec((H, 6 * H), lambda b, t: (0, 0)),          # fused w_hh (resident)
                pl.BlockSpec((1, H), lambda b, t: (0, 0)),              # w_a (resident)
                pl.BlockSpec(memory_space=pltpu.MemorySpace.SMEM),      # b_a scalar
            ],
            out_specs=pl.BlockSpec((TT, TB, H), lambda b, t: (t, b, 0)),
            scratch_shapes=[
                pltpu.VMEM((TB, H), jnp.float32),   # h carry
                pltpu.VMEM((TB, H), jnp.float32),   # c carry
            ],
        ),
        compiler_params=pltpu.CompilerParams(
            dimension_semantics=("parallel", "arbitrary"),
            vmem_limit_bytes=64 * 1024 * 1024,
        ),
    )(gates_in, whh_fused, w_a, b_a)

    # Reproduce torch: torch.cat(output, 0) -> (T*B, H), then .view(B, T, H).
    return out_tbh.reshape(T * B, H).reshape(B, T, H)


def milstm_chain_ref(x, x_p, p):
    """Pure-JAX f32 reference of the PyTorch forward (for verification)."""
    B, T, H = x.shape
    h = jnp.zeros((B, H), jnp.float32)
    c = jnp.zeros((B, H), jnp.float32)
    outs = []
    for t in range(T):
        xt, xpt = x[:, t], x_p[:, t]
        gates = xt @ p["w_ih"].T + p["b_ih"] + h @ p["w_hh"].T + p["b_hh"]
        gates_p = xpt @ p["w_ih_p"].T + p["b_ih_p"] + h @ p["w_hh_p"].T + p["b_hh_p"]
        ingate = jax.nn.sigmoid(gates[:, 0:H])
        forgetgate = jax.nn.sigmoid(gates[:, H:2 * H])
        cellgate = jnp.tanh(gates[:, 2 * H:3 * H])
        outgate = jax.nn.sigmoid(gates[:, 3 * H:4 * H])
        ingate_p = jax.nn.sigmoid(gates_p[:, 0:H])
        cellgate_p = jnp.tanh(gates_p[:, H:2 * H])
        l = ingate * cellgate
        l_p = ingate_p * cellgate_p
        u = jnp.tanh(l @ p["w_a"].T + p["b_a"])
        u_p = jnp.tanh(l_p @ p["w_a"].T + p["b_a"])
        A = jax.nn.softmax(jnp.concatenate([u, u_p], axis=1), axis=1)
        L = A[:, 0:1] * l + A[:, 1:2] * l_p
        c = forgetgate * c + L
        h = outgate * jnp.tanh(c)
        outs.append(h)
    return jnp.concatenate(outs, axis=0).reshape(B, T, H)


def make_params(key, hidden_size):
    H = hidden_size
    stdv = 1.0 / math.sqrt(H)
    ks = jax.random.split(key, 10)
    u = lambda k, shape: jax.random.uniform(k, shape, jnp.float32, -stdv, stdv)
    # NOTE: PyTorch resetParameters() zeroes the *_p weights/biases; kept random
    # (deterministic) here so the full compute path is actually exercised.
    return {
        "w_ih": u(ks[0], (4 * H, H)),
        "w_ih_p": u(ks[1], (2 * H, H)),
        "w_hh": u(ks[2], (4 * H, H)),
        "w_hh_p": u(ks[3], (2 * H, H)),
        "w_a": u(ks[4], (1, H)),
        "b_ih": u(ks[5], (4 * H,)),
        "b_ih_p": u(ks[6], (2 * H,)),
        "b_hh": u(ks[7], (4 * H,)),
        "b_hh_p": u(ks[8], (2 * H,)),
        "b_a": u(ks[9], (1,)),
    }


if __name__ == "__main__":
    B, T, H = 2, 8, 32   # batch, seq, hidden (input_size == hidden_size in this module)
    key = jax.random.PRNGKey(0)
    kx, kxp, kp = jax.random.split(key, 3)
    x = jax.random.normal(kx, (B, T, H), jnp.float32)
    x_p = jax.random.normal(kxp, (B, T, H), jnp.float32)
    params = make_params(kp, H)

    out = jax.block_until_ready(milstm_chain_forward(x, x_p, params))
    ref = jax.block_until_ready(milstm_chain_ref(x, x_p, params))

    assert out.shape == (B, T, H), out.shape
    # Tolerance widened slightly vs. an all-f32 kernel: recurrent matmul operands are bf16
    # (f32 accumulation / f32 state), giving ~1e-3-level differences from the f32 reference.
    err = float(jnp.max(jnp.abs(out - ref)))
    assert jnp.allclose(out, ref, atol=1e-2, rtol=1e-2), err

    print("KERNEL_OK")
</pallas_src>

<mosaic_0001>
module attributes {stable_mosaic.version = 11 : i64} {
  func.func @_milstm_recurrent_kernel(%arg0: i32, %arg1: i32, %arg2: memref<8x2x192xf32, #tpu.memory_space<vmem>>, %arg3: memref<32x192xbf16, #tpu.memory_space<vmem>>, %arg4: memref<1x32xf32, #tpu.memory_space<vmem>>, %arg5: memref<1x1xf32, #tpu.memory_space<smem>>, %arg6: memref<8x2x32xf32, #tpu.memory_space<vmem>>, %arg7: memref<2x32xf32, #tpu.memory_space<vmem>>, %arg8: memref<2x32xf32, #tpu.memory_space<vmem>>) attributes {dimension_semantics = [#tpu.dimension_semantics<parallel>, #tpu.dimension_semantics<arbitrary>], iteration_bounds = array<i64: 1, 1>, scalar_prefetch = 0 : i64, scratch_operands = 2 : i64, tpu.core_type = #tpu.core_type<tc>, window_params = [{transform_indices = @transform_0, window_bounds = array<i64: 8, 2, 192>}, {pipeline_mode = #tpu.pipeline_mode<synchronous>, transform_indices = @transform_1, window_bounds = array<i64: 32, 192>}, {pipeline_mode = #tpu.pipeline_mode<synchronous>, transform_indices = @transform_2, window_bounds = array<i64: 1, 32>}, {transform_indices = @transform_3, window_bounds = array<i64: 1, 1>}, {transform_indices = @transform_4, window_bounds = array<i64: 8, 2, 32>}]} {
    %c0_i32 = arith.constant 0 : i32
    %0 = arith.cmpi eq, %arg1, %c0_i32 : i32
    %1 = arith.extui %0 : i1 to i32
    %c0_i32_0 = arith.constant 0 : i32
    %2 = arith.cmpi ne, %1, %c0_i32_0 : i32
    scf.if %2 {
      %cst_102 = arith.constant 0.000000e+00 : f32
      %586 = vector.broadcast %cst_102 : f32 to vector<2x32xf32>
      %c0_103 = arith.constant 0 : index
      %c0_104 = arith.constant 0 : index
      %587 = vector.load %arg7[%c0_103, %c0_104] : memref<2x32xf32, #tpu.memory_space<vmem>>, vector<2x32xf32>
      tpu.vector_store %arg7[%c0_103, %c0_104], %586 {strides = array<i32>} : memref<2x32xf32, #tpu.memory_space<vmem>>, vector<2x32xf32>,
      %cst_105 = arith.constant 0.000000e+00 : f32
      %588 = vector.broadcast %cst_105 : f32 to vector<2x32xf32>
      %c0_106 = arith.constant 0 : index
      %c0_107 = arith.constant 0 : index
      %589 = vector.load %arg8[%c0_106, %c0_107] : memref<2x32xf32, #tpu.memory_space<vmem>>, vector<2x32xf32>
      tpu.vector_store %arg8[%c0_106, %c0_107], %588 {strides = array<i32>} : memref<2x32xf32, #tpu.memory_space<vmem>>, vector<2x32xf32>,
    } else {
    }
    %c0 = arith.constant 0 : index
    %c0_1 = arith.constant 0 : index
    %3 = vector.load %arg3[%c0, %c0_1] : memref<32x192xbf16, #tpu.memory_space<vmem>>, vector<32x192xbf16>
    %c0_2 = arith.constant 0 : index
    %c0_3 = arith.constant 0 : index
    %4 = vector.load %arg4[%c0_2, %c0_3] : memref<1x32xf32, #tpu.memory_space<vmem>>, vector<1x32xf32>
    %c0_4 = arith.constant 0 : index
    %c0_5 = arith.constant 0 : index
    %5 = memref.load %arg5[%c0_4, %c0_5] : memref<1x1xf32, #tpu.memory_space<smem>>
    %c0_6 = arith.constant 0 : index
    %c0_7 = arith.constant 0 : index
    %6 = vector.load %arg7[%c0_6, %c0_7] : memref<2x32xf32, #tpu.memory_space<vmem>>, vector<2x32xf32>
    %c0_8 = arith.constant 0 : index
    %c0_9 = arith.constant 0 : index
    %7 = vector.load %arg8[%c0_8, %c0_9] : memref<2x32xf32, #tpu.memory_space<vmem>>, vector<2x32xf32>
    %c0_i32_10 = arith.constant 0 : i32
    %8 = arith.truncf %6 : vector<2x32xf32> to vector<2x32xbf16>
    %cst = arith.constant dense<0.000000e+00> : vector<2x192xf32>
    %9 = tpu.matmul %8, %3, %cst {dimension_numbers = #tpu.dot_dimension_numbers<[1], [0], [0], [1], [0, 0, 1, 1], [], []>} : vector<2x32xbf16>, vector<32x192xbf16>, vector<2x192xf32> -> vector<2x192xf32>
    %10 = arith.index_cast %c0_i32_10 : i32 to index
    %c0_11 = arith.constant 0 : index
    %c0_12 = arith.constant 0 : index
    %11 = vector.load %arg2[%10, %c0_11, %c0_12] : memref<8x2x192xf32, #tpu.memory_space<vmem>>, vector<1x2x192xf32>
    %12 = vector.shape_cast %11 : vector<1x2x192xf32> to vector<2x192xf32>
    %13 = arith.addf %12, %9 : vector<2x192xf32>
    %14 = vector.extract_strided_slice %13 {offsets = [0, 0], sizes = [2, 32], strides = [1, 1]} : vector<2x192xf32> to vector<2x32xf32>
    %15 = arith.negf %14 : vector<2x32xf32>
    %16 = math.exp %15 : vector<2x32xf32>
    %cst_13 = arith.constant 1.000000e+00 : f32
    %17 = vector.broadcast %cst_13 : f32 to vector<2x32xf32>
    %18 = arith.addf %17, %16 : vector<2x32xf32>
    %19 = arith.divf %17, %18 : vector<2x32xf32>
    %20 = vector.extract_strided_slice %13 {offsets = [0, 32], sizes = [2, 32], strides = [1, 1]} : vector<2x192xf32> to vector<2x32xf32>
    %21 = arith.negf %20 : vector<2x32xf32>
    %22 = math.exp %21 : vector<2x32xf32>
    %cst_14 = arith.constant 1.000000e+00 : f32
    %23 = vector.broadcast %cst_14 : f32 to vector<2x32xf32>
    %24 = arith.addf %23, %22 : vector<2x32xf32>
    %25 = arith.divf %23, %24 : vector<2x32xf32>
    %26 = vector.extract_strided_slice %13 {offsets = [0, 64], sizes = [2, 32], strides = [1, 1]} : vector<2x192xf32> to vector<2x32xf32>
    %27 = math.tanh %26 : vector<2x32xf32>
    %28 = vector.extract_strided_slice %13 {offsets = [0, 96], sizes = [2, 32], strides = [1, 1]} : vector<2x192xf32> to vector<2x32xf32>
    %29 = arith.negf %28 : vector<2x32xf32>
    %30 = math.exp %29 : vector<2x32xf32>
    %cst_15 = arith.constant 1.000000e+00 : f32
    %31 = vector.broadcast %cst_15 : f32 to vector<2x32xf32>
    %32 = arith.addf %31, %30 : vector<2x32xf32>
    %33 = arith.divf %31, %32 : vector<2x32xf32>
    %34 = vector.extract_strided_slice %13 {offsets = [0, 128], sizes = [2, 32], strides = [1, 1]} : vector<2x192xf32> to vector<2x32xf32>
    %35 = arith.negf %34 : vector<2x32xf32>
    %36 = math.exp %35 : vector<2x32xf32>
    %cst_16 = arith.constant 1.000000e+00 : f32
    %37 = vector.broadcast %cst_16 : f32 to vector<2x32xf32>
    %38 = arith.addf %37, %36 : vector<2x32xf32>
    %39 = arith.divf %37, %38 : vector<2x32xf32>
    %40 = vector.extract_strided_slice %13 {offsets = [0, 160], sizes = [2, 32], strides = [1, 1]} : vector<2x192xf32> to vector<2x32xf32>
    %41 = math.tanh %40 : vector<2x32xf32>
    %42 = arith.mulf %19, %27 : vector<2x32xf32>
    %43 = arith.mulf %39, %41 : vector<2x32xf32>
    %44 = vector.broadcast %4 : vector<1x32xf32> to vector<2x32xf32>
    %45 = arith.mulf %42, %44 : vector<2x32xf32>
    %cst_17 = arith.constant dense<0.000000e+00> : vector<2xf32>
    %46 = vector.multi_reduction <add>, %45, %cst_17 [1] : vector<2x32xf32> to vector<2xf32>
    %47 = vector.shape_cast %46 : vector<2xf32> to vector<2x1xf32>
    %48 = vector.broadcast %5 : f32 to vector<2x1xf32>
    %49 = arith.addf %47, %48 : vector<2x1xf32>
    %50 = math.tanh %49 : vector<2x1xf32>
    %51 = vector.broadcast %4 : vector<1x32xf32> to vector<2x32xf32>
    %52 = arith.mulf %43, %51 : vector<2x32xf32>
    %cst_18 = arith.constant dense<0.000000e+00> : vector<2xf32>
    %53 = vector.multi_reduction <add>, %52, %cst_18 [1] : vector<2x32xf32> to vector<2xf32>
    %54 = vector.shape_cast %53 : vector<2xf32> to vector<2x1xf32>
    %55 = vector.broadcast %5 : f32 to vector<2x1xf32>
    %56 = arith.addf %54, %55 : vector<2x1xf32>
    %57 = math.tanh %56 : vector<2x1xf32>
    %58 = arith.maximumf %50, %57 : vector<2x1xf32>
    %59 = arith.subf %50, %58 : vector<2x1xf32>
    %60 = math.exp %59 : vector<2x1xf32>
    %61 = arith.subf %57, %58 : vector<2x1xf32>
    %62 = math.exp %61 : vector<2x1xf32>
    %63 = arith.addf %60, %62 : vector<2x1xf32>
    %64 = tpu.reciprocal %63 {approx = true} : vector<2x1xf32> -> vector<2x1xf32>
    %65 = arith.mulf %60, %64 : vector<2x1xf32>
    %66 = vector.broadcast %65 : vector<2x1xf32> to vector<2x32xf32>
    %67 = arith.mulf %66, %42 : vector<2x32xf32>
    %68 = arith.mulf %62, %64 : vector<2x1xf32>
    %69 = vector.broadcast %68 : vector<2x1xf32> to vector<2x32xf32>
    %70 = arith.mulf %69, %43 : vector<2x32xf32>
    %71 = arith.addf %67, %70 : vector<2x32xf32>
    %72 = arith.mulf %25, %7 : vector<2x32xf32>
    %73 = arith.addf %72, %71 : vector<2x32xf32>
    %74 = math.tanh %73 : vector<2x32xf32>
    %75 = arith.mulf %33, %74 : vector<2x32xf32>
    %76 = arith.index_cast %c0_i32_10 : i32 to index
    %c0_19 = arith.constant 0 : index
    %c0_20 = arith.constant 0 : index
    %77 = vector.load %arg6[%76, %c0_19, %c0_20] : memref<8x2x32xf32, #tpu.memory_space<vmem>>, vector<1x2x32xf32>
    %78 = vector.shape_cast %77 : vector<1x2x32xf32> to vector<2x32xf32>
    %79 = vector.shape_cast %75 : vector<2x32xf32> to vector<1x2x32xf32>
    tpu.vector_store %arg6[%76, %c0_19, %c0_20], %79 {strides = array<i32>} : memref<8x2x32xf32, #tpu.memory_space<vmem>>, vector<1x2x32xf32>,
    %c1_i32 = arith.constant 1 : i32
    %80 = arith.truncf %75 : vector<2x32xf32> to vector<2x32xbf16>
    %cst_21 = arith.constant dense<0.000000e+00> : vector<2x192xf32>
    %81 = tpu.matmul %80, %3, %cst_21 {dimension_numbers = #tpu.dot_dimension_numbers<[1], [0], [0], [1], [0, 0, 1, 1], [], []>} : vector<2x32xbf16>, vector<32x192xbf16>, vector<2x192xf32> -> vector<2x192xf32>
    %82 = arith.index_cast %c1_i32 : i32 to index
    %c0_22 = arith.constant 0 : index
    %c0_23 = arith.constant 0 : index
    %83 = vector.load %arg2[%82, %c0_22, %c0_23] : memref<8x2x192xf32, #tpu.memory_space<vmem>>, vector<1x2x192xf32>
    %84 = vector.shape_cast %83 : vector<1x2x192xf32> to vector<2x192xf32>
    %85 = arith.addf %84, %81 : vector<2x192xf32>
    %86 = vector.extract_strided_slice %85 {offsets = [0, 0], sizes = [2, 32], strides = [1, 1]} : vector<2x192xf32> to vector<2x32xf32>
    %87 = arith.negf %86 : vector<2x32xf32>
    %88 = math.exp %87 : vector<2x32xf32>
    %cst_24 = arith.constant 1.000000e+00 : f32
    %89 = vector.broadcast %cst_24 : f32 to vector<2x32xf32>
    %90 = arith.addf %89, %88 : vector<2x32xf32>
    %91 = arith.divf %89, %90 : vector<2x32xf32>
    %92 = vector.extract_strided_slice %85 {offsets = [0, 32], sizes = [2, 32], strides = [1, 1]} : vector<2x192xf32> to vector<2x32xf32>
    %93 = arith.negf %92 : vector<2x32xf32>
    %94 = math.exp %93 : vector<2x32xf32>
    %cst_25 = arith.constant 1.000000e+00 : f32
    %95 = vector.broadcast %cst_25 : f32 to vector<2x32xf32>
    %96 = arith.addf %95, %94 : vector<2x32xf32>
    %97 = arith.divf %95, %96 : vector<2x32xf32>
    %98 = vector.extract_strided_slice %85 {offsets = [0, 64], sizes = [2, 32], strides = [1, 1]} : vector<2x192xf32> to vector<2x32xf32>
    %99 = math.tanh %98 : vector<2x32xf32>
    %100 = vector.extract_strided_slice %85 {offsets = [0, 96], sizes = [2, 32], strides = [1, 1]} : vector<2x192xf32> to vector<2x32xf32>
    %101 = arith.negf %100 : vector<2x32xf32>
    %102 = math.exp %101 : vector<2x32xf32>
    %cst_26 = arith.constant 1.000000e+00 : f32
    %103 = vector.broadcast %cst_26 : f32 to vector<2x32xf32>
    %104 = arith.addf %103, %102 : vector<2x32xf32>
    %105 = arith.divf %103, %104 : vector<2x32xf32>
    %106 = vector.extract_strided_slice %85 {offsets = [0, 128], sizes = [2, 32], strides = [1, 1]} : vector<2x192xf32> to vector<2x32xf32>
    %107 = arith.negf %106 : vector<2x32xf32>
    %108 = math.exp %107 : vector<2x32xf32>
    %cst_27 = arith.constant 1.000000e+00 : f32
    %109 = vector.broadcast %cst_27 : f32 to vector<2x32xf32>
    %110 = arith.addf %109, %108 : vector<2x32xf32>
    %111 = arith.divf %109, %110 : vector<2x32xf32>
    %112 = vector.extract_strided_slice %85 {offsets = [0, 160], sizes = [2, 32], strides = [1, 1]} : vector<2x192xf32> to vector<2x32xf32>
    %113 = math.tanh %112 : vector<2x32xf32>
    %114 = arith.mulf %91, %99 : vector<2x32xf32>
    %115 = arith.mulf %111, %113 : vector<2x32xf32>
    %116 = vector.broadcast %4 : vector<1x32xf32> to vector<2x32xf32>
    %117 = arith.mulf %114, %116 : vector<2x32xf32>
    %cst_28 = arith.constant dense<0.000000e+00> : vector<2xf32>
    %118 = vector.multi_reduction <add>, %117, %cst_28 [1] : vector<2x32xf32> to vector<2xf32>
    %119 = vector.shape_cast %118 : vector<2xf32> to vector<2x1xf32>
    %120 = vector.broadcast %5 : f32 to vector<2x1xf32>
    %121 = arith.addf %119, %120 : vector<2x1xf32>
    %122 = math.tanh %121 : vector<2x1xf32>
    %123 = vector.broadcast %4 : vector<1x32xf32> to vector<2x32xf32>
    %124 = arith.mulf %115, %123 : vector<2x32xf32>
    %cst_29 = arith.constant dense<0.000000e+00> : vector<2xf32>
    %125 = vector.multi_reduction <add>, %124, %cst_29 [1] : vector<2x32xf32> to vector<2xf32>
    %126 = vector.shape_cast %125 : vector<2xf32> to vector<2x1xf32>
    %127 = vector.broadcast %5 : f32 to vector<2x1xf32>
    %128 = arith.addf %126, %127 : vector<2x1xf32>
    %129 = math.tanh %128 : vector<2x1xf32>
    %130 = arith.maximumf %122, %129 : vector<2x1xf32>
    %131 = arith.subf %122, %130 : vector<2x1xf32>
    %132 = math.exp %131 : vector<2x1xf32>
    %133 = arith.subf %129, %130 : vector<2x1xf32>
    %134 = math.exp %133 : vector<2x1xf32>
    %135 = arith.addf %132, %134 : vector<2x1xf32>
    %136 = tpu.reciprocal %135 {approx = true} : vector<2x1xf32> -> vector<2x1xf32>
    %137 = arith.mulf %132, %136 : vector<2x1xf32>
    %138 = vector.broadcast %137 : vector<2x1xf32> to vector<2x32xf32>
    %139 = arith.mulf %138, %114 : vector<2x32xf32>
    %140 = arith.mulf %134, %136 : vector<2x1xf32>
    %141 = vector.broadcast %140 : vector<2x1xf32> to vector<2x32xf32>
    %142 = arith.mulf %141, %115 : vector<2x32xf32>
    %143 = arith.addf %139, %142 : vector<2x32xf32>
    %144 = arith.mulf %97, %73 : vector<2x32xf32>
    %145 = arith.addf %144, %143 : vector<2x32xf32>
    %146 = math.tanh %145 : vector<2x32xf32>
    %147 = arith.mulf %105, %146 : vector<2x32xf32>
    %148 = arith.index_cast %c1_i32 : i32 to index
    %c0_30 = arith.constant 0 : index
    %c0_31 = arith.constant 0 : index
    %149 = vector.load %arg6[%148, %c0_30, %c0_31] : memref<8x2x32xf32, #tpu.memory_space<vmem>>, vector<1x2x32xf32>
    %150 = vector.shape_cast %149 : vector<1x2x32xf32> to vector<2x32xf32>
    %151 = vector.shape_cast %147 : vector<2x32xf32> to vector<1x2x32xf32>
    tpu.vector_store %arg6[%148, %c0_30, %c0_31], %151 {strides = array<i32>} : memref<8x2x32xf32, #tpu.memory_space<vmem>>, vector<1x2x32xf32>,
    %c2_i32 = arith.constant 2 : i32
    %152 = arith.truncf %147 : vector<2x32xf32> to vector<2x32xbf16>
    %cst_32 = arith.constant dense<0.000000e+00> : vector<2x192xf32>
    %153 = tpu.matmul %152, %3, %cst_32 {dimension_numbers = #tpu.dot_dimension_numbers<[1], [0], [0], [1], [0, 0, 1, 1], [], []>} : vector<2x32xbf16>, vector<32x192xbf16>, vector<2x192xf32> -> vector<2x192xf32>
    %154 = arith.index_cast %c2_i32 : i32 to index
    %c0_33 = arith.constant 0 : index
    %c0_34 = arith.constant 0 : index
    %155 = vector.load %arg2[%154, %c0_33, %c0_34] : memref<8x2x192xf32, #tpu.memory_space<vmem>>, vector<1x2x192xf32>
    %156 = vector.shape_cast %155 : vector<1x2x192xf32> to vector<2x192xf32>
    %157 = arith.addf %156, %153 : vector<2x192xf32>
    %158 = vector.extract_strided_slice %157 {offsets = [0, 0], sizes = [2, 32], strides = [1, 1]} : vector<2x192xf32> to vector<2x32xf32>
    %159 = arith.negf %158 : vector<2x32xf32>
    %160 = math.exp %159 : vector<2x32xf32>
    %cst_35 = arith.constant 1.000000e+00 : f32
    %161 = vector.broadcast %cst_35 : f32 to vector<2x32xf32>
    %162 = arith.addf %161, %160 : vector<2x32xf32>
    %163 = arith.divf %161, %162 : vector<2x32xf32>
    %164 = vector.extract_strided_slice %157 {offsets = [0, 32], sizes = [2, 32], strides = [1, 1]} : vector<2x192xf32> to vector<2x32xf32>
    %165 = arith.negf %164 : vector<2x32xf32>
    %166 = math.exp %165 : vector<2x32xf32>
    %cst_36 = arith.constant 1.000000e+00 : f32
    %167 = vector.broadcast %cst_36 : f32 to vector<2x32xf32>
    %168 = arith.addf %167, %166 : vector<2x32xf32>
    %169 = arith.divf %167, %168 : vector<2x32xf32>
    %170 = vector.extract_strided_slice %157 {offsets = [0, 64], sizes = [2, 32], strides = [1, 1]} : vector<2x192xf32> to vector<2x32xf32>
    %171 = math.tanh %170 : vector<2x32xf32>
    %172 = vector.extract_strided_slice %157 {offsets = [0, 96], sizes = [2, 32], strides = [1, 1]} : vector<2x192xf32> to vector<2x32xf32>
    %173 = arith.negf %172 : vector<2x32xf32>
    %174 = math.exp %173 : vector<2x32xf32>
    %cst_37 = arith.constant 1.000000e+00 : f32
    %175 = vector.broadcast %cst_37 : f32 to vector<2x32xf32>
    %176 = arith.addf %175, %174 : vector<2x32xf32>
    %177 = arith.divf %175, %176 : vector<2x32xf32>
    %178 = vector.extract_strided_slice %157 {offsets = [0, 128], sizes = [2, 32], strides = [1, 1]} : vector<2x192xf32> to vector<2x32xf32>
    %179 = arith.negf %178 : vector<2x32xf32>
    %180 = math.exp %179 : vector<2x32xf32>
    %cst_38 = arith.constant 1.000000e+00 : f32
    %181 = vector.broadcast %cst_38 : f32 to vector<2x32xf32>
    %182 = arith.addf %181, %180 : vector<2x32xf32>
    %183 = arith.divf %181, %182 : vector<2x32xf32>
    %184 = vector.extract_strided_slice %157 {offsets = [0, 160], sizes = [2, 32], strides = [1, 1]} : vector<2x192xf32> to vector<2x32xf32>
    %185 = math.tanh %184 : vector<2x32xf32>
    %186 = arith.mulf %163, %171 : vector<2x32xf32>
    %187 = arith.mulf %183, %185 : vector<2x32xf32>
    %188 = vector.broadcast %4 : vector<1x32xf32> to vector<2x32xf32>
    %189 = arith.mulf %186, %188 : vector<2x32xf32>
    %cst_39 = arith.constant dense<0.000000e+00> : vector<2xf32>
    %190 = vector.multi_reduction <add>, %189, %cst_39 [1] : vector<2x32xf32> to vector<2xf32>
    %191 = vector.shape_cast %190 : vector<2xf32> to vector<2x1xf32>
    %192 = vector.broadcast %5 : f32 to vector<2x1xf32>
    %193 = arith.addf %191, %192 : vector<2x1xf32>
    %194 = math.tanh %193 : vector<2x1xf32>
    %195 = vector.broadcast %4 : vector<1x32xf32> to vector<2x32xf32>
    %196 = arith.mulf %187, %195 : vector<2x32xf32>
    %cst_40 = arith.constant dense<0.000000e+00> : vector<2xf32>
    %197 = vector.multi_reduction <add>, %196, %cst_40 [1] : vector<2x32xf32> to vector<2xf32>
    %198 = vector.shape_cast %197 : vector<2xf32> to vector<2x1xf32>
    %199 = vector.broadcast %5 : f32 to vector<2x1xf32>
    %200 = arith.addf %198, %199 : vector<2x1xf32>
    %201 = math.tanh %200 : vector<2x1xf32>
    %202 = arith.maximumf %194, %201 : vector<2x1xf32>
    %203 = arith.subf %194, %202 : vector<2x1xf32>
    %204 = math.exp %203 : vector<2x1xf32>
    %205 = arith.subf %201, %202 : vector<2x1xf32>
    %206 = math.exp %205 : vector<2x1xf32>
    %207 = arith.addf %204, %206 : vector<2x1xf32>
    %208 = tpu.reciprocal %207 {approx = true} : vector<2x1xf32> -> vector<2x1xf32>
    %209 = arith.mulf %204, %208 : vector<2x1xf32>
    %210 = vector.broadcast %209 : vector<2x1xf32> to vector<2x32xf32>
    %211 = arith.mulf %210, %186 : vector<2x32xf32>
    %212 = arith.mulf %206, %208 : vector<2x1xf32>
    %213 = vector.broadcast %212 : vector<2x1xf32> to vector<2x32xf32>
    %214 = arith.mulf %213, %187 : vector<2x32xf32>
    %215 = arith.addf %211, %214 : vector<2x32xf32>
    %216 = arith.mulf %169, %145 : vector<2x32xf32>
    %217 = arith.addf %216, %215 : vector<2x32xf32>
    %218 = math.tanh %217 : vector<2x32xf32>
    %219 = arith.mulf %177, %218 : vector<2x32xf32>
    %220 = arith.index_cast %c2_i32 : i32 to index
    %c0_41 = arith.constant 0 : index
    %c0_42 = arith.constant 0 : index
    %221 = vector.load %arg6[%220, %c0_41, %c0_42] : memref<8x2x32xf32, #tpu.memory_space<vmem>>, vector<1x2x32xf32>
    %222 = vector.shape_cast %221 : vector<1x2x32xf32> to vector<2x32xf32>
    %223 = vector.shape_cast %219 : vector<2x32xf32> to vector<1x2x32xf32>
    tpu.vector_store %arg6[%220, %c0_41, %c0_42], %223 {strides = array<i32>} : memref<8x2x32xf32, #tpu.memory_space<vmem>>, vector<1x2x32xf32>,
    %c3_i32 = arith.constant 3 : i32
    %224 = arith.truncf %219 : vector<2x32xf32> to vector<2x32xbf16>
    %cst_43 = arith.constant dense<0.000000e+00> : vector<2x192xf32>
    %225 = tpu.matmul %224, %3, %cst_43 {dimension_numbers = #tpu.dot_dimension_numbers<[1], [0], [0], [1], [0, 0, 1, 1], [], []>} : vector<2x32xbf16>, vector<32x192xbf16>, vector<2x192xf32> -> vector<2x192xf32>
    %226 = arith.index_cast %c3_i32 : i32 to index
    %c0_44 = arith.constant 0 : index
    %c0_45 = arith.constant 0 : index
    %227 = vector.load %arg2[%226, %c0_44, %c0_45] : memref<8x2x192xf32, #tpu.memory_space<vmem>>, vector<1x2x192xf32>
    %228 = vector.shape_cast %227 : vector<1x2x192xf32> to vector<2x192xf32>
    %229 = arith.addf %228, %225 : vector<2x192xf32>
    %230 = vector.extract_strided_slice %229 {offsets = [0, 0], sizes = [2, 32], strides = [1, 1]} : vector<2x192xf32> to vector<2x32xf32>
    %231 = arith.negf %230 : vector<2x32xf32>
    %232 = math.exp %231 : vector<2x32xf32>
    %cst_46 = arith.constant 1.000000e+00 : f32
    %233 = vector.broadcast %cst_46 : f32 to vector<2x32xf32>
    %234 = arith.addf %233, %232 : vector<2x32xf32>
    %235 = arith.divf %233, %234 : vector<2x32xf32>
    %236 = vector.extract_strided_slice %229 {offsets = [0, 32], sizes = [2, 32], strides = [1, 1]} : vector<2x192xf32> to vector<2x32xf32>
    %237 = arith.negf %236 : vector<2x32xf32>
    %238 = math.exp %237 : vector<2x32xf32>
    %cst_47 = arith.constant 1.000000e+00 : f32
    %239 = vector.broadcast %cst_47 : f32 to vector<2x32xf32>
    %240 = arith.addf %239, %238 : vector<2x32xf32>
    %241 = arith.divf %239, %240 : vector<2x32xf32>
    %242 = vector.extract_strided_slice %229 {offsets = [0, 64], sizes = [2, 32], strides = [1, 1]} : vector<2x192xf32> to vector<2x32xf32>
    %243 = math.tanh %242 : vector<2x32xf32>
    %244 = vector.extract_strided_slice %229 {offsets = [0, 96], sizes = [2, 32], strides = [1, 1]} : vector<2x192xf32> to vector<2x32xf32>
    %245 = arith.negf %244 : vector<2x32xf32>
    %246 = math.exp %245 : vector<2x32xf32>
    %cst_48 = arith.constant 1.000000e+00 : f32
    %247 = vector.broadcast %cst_48 : f32 to vector<2x32xf32>
    %248 = arith.addf %247, %246 : vector<2x32xf32>
    %249 = arith.divf %247, %248 : vector<2x32xf32>
    %250 = vector.extract_strided_slice %229 {offsets = [0, 128], sizes = [2, 32], strides = [1, 1]} : vector<2x192xf32> to vector<2x32xf32>
    %251 = arith.negf %250 : vector<2x32xf32>
    %252 = math.exp %251 : vector<2x32xf32>
    %cst_49 = arith.constant 1.000000e+00 : f32
    %253 = vector.broadcast %cst_49 : f32 to vector<2x32xf32>
    %254 = arith.addf %253, %252 : vector<2x32xf32>
    %255 = arith.divf %253, %254 : vector<2x32xf32>
    %256 = vector.extract_strided_slice %229 {offsets = [0, 160], sizes = [2, 32], strides = [1, 1]} : vector<2x192xf32> to vector<2x32xf32>
    %257 = math.tanh %256 : vector<2x32xf32>
    %258 = arith.mulf %235, %243 : vector<2x32xf32>
    %259 = arith.mulf %255, %257 : vector<2x32xf32>
    %260 = vector.broadcast %4 : vector<1x32xf32> to vector<2x32xf32>
    %261 = arith.mulf %258, %260 : vector<2x32xf32>
    %cst_50 = arith.constant dense<0.000000e+00> : vector<2xf32>
    %262 = vector.multi_reduction <add>, %261, %cst_50 [1] : vector<2x32xf32> to vector<2xf32>
    %263 = vector.shape_cast %262 : vector<2xf32> to vector<2x1xf32>
    %264 = vector.broadcast %5 : f32 to vector<2x1xf32>
    %265 = arith.addf %263, %264 : vector<2x1xf32>
    %266 = math.tanh %265 : vector<2x1xf32>
    %267 = vector.broadcast %4 : vector<1x32xf32> to vector<2x32xf32>
    %268 = arith.mulf %259, %267 : vector<2x32xf32>
    %cst_51 = arith.constant dense<0.000000e+00> : vector<2xf32>
    %269 = vector.multi_reduction <add>, %268, %cst_51 [1] : vector<2x32xf32> to vector<2xf32>
    %270 = vector.shape_cast %269 : vector<2xf32> to vector<2x1xf32>
    %271 = vector.broadcast %5 : f32 to vector<2x1xf32>
    %272 = arith.addf %270, %271 : vector<2x1xf32>
    %273 = math.tanh %272 : vector<2x1xf32>
    %274 = arith.maximumf %266, %273 : vector<2x1xf32>
    %275 = arith.subf %266, %274 : vector<2x1xf32>
    %276 = math.exp %275 : vector<2x1xf32>
    %277 = arith.subf %273, %274 : vector<2x1xf32>
    %278 = math.exp %277 : vector<2x1xf32>
    %279 = arith.addf %276, %278 : vector<2x1xf32>
    %280 = tpu.reciprocal %279 {approx = true} : vector<2x1xf32> -> vector<2x1xf32>
    %281 = arith.mulf %276, %280 : vector<2x1xf32>
    %282 = vector.broadcast %281 : vector<2x1xf32> to vector<2x32xf32>
    %283 = arith.mulf %282, %258 : vector<2x32xf32>
    %284 = arith.mulf %278, %280 : vector<2x1xf32>
    %285 = vector.broadcast %284 : vector<2x1xf32> to vector<2x32xf32>
    %286 = arith.mulf %285, %259 : vector<2x32xf32>
    %287 = arith.addf %283, %286 : vector<2x32xf32>
    %288 = arith.mulf %241, %217 : vector<2x32xf32>
    %289 = arith.addf %288, %287 : vector<2x32xf32>
    %290 = math.tanh %289 : vector<2x32xf32>
    %291 = arith.mulf %249, %290 : vector<2x32xf32>
    %292 = arith.index_cast %c3_i32 : i32 to index
    %c0_52 = arith.constant 0 : index
    %c0_53 = arith.constant 0 : index
    %293 = vector.load %arg6[%292, %c0_52, %c0_53] : memref<8x2x32xf32, #tpu.memory_space<vmem>>, vector<1x2x32xf32>
    %294 = vector.shape_cast %293 : vector<1x2x32xf32> to vector<2x32xf32>
    %295 = vector.shape_cast %291 : vector<2x32xf32> to vector<1x2x32xf32>
    tpu.vector_store %arg6[%292, %c0_52, %c0_53], %295 {strides = array<i32>} : memref<8x2x32xf32, #tpu.memory_space<vmem>>, vector<1x2x32xf32>,
    %c4_i32 = arith.constant 4 : i32
    %296 = arith.truncf %291 : vector<2x32xf32> to vector<2x32xbf16>
    %cst_54 = arith.constant dense<0.000000e+00> : vector<2x192xf32>
    %297 = tpu.matmul %296, %3, %cst_54 {dimension_numbers = #tpu.dot_dimension_numbers<[1], [0], [0], [1], [0, 0, 1, 1], [], []>} : vector<2x32xbf16>, vector<32x192xbf16>, vector<2x192xf32> -> vector<2x192xf32>
    %298 = arith.index_cast %c4_i32 : i32 to index
    %c0_55 = arith.constant 0 : index
    %c0_56 = arith.constant 0 : index
    %299 = vector.load %arg2[%298, %c0_55, %c0_56] : memref<8x2x192xf32, #tpu.memory_space<vmem>>, vector<1x2x192xf32>
    %300 = vector.shape_cast %299 : vector<1x2x192xf32> to vector<2x192xf32>
    %301 = arith.addf %300, %297 : vector<2x192xf32>
    %302 = vector.extract_strided_slice %301 {offsets = [0, 0], sizes = [2, 32], strides = [1, 1]} : vector<2x192xf32> to vector<2x32xf32>
    %303 = arith.negf %302 : vector<2x32xf32>
    %304 = math.exp %303 : vector<2x32xf32>
    %cst_57 = arith.constant 1.000000e+00 : f32
    %305 = vector.broadcast %cst_57 : f32 to vector<2x32xf32>
    %306 = arith.addf %305, %304 : vector<2x32xf32>
    %307 = arith.divf %305, %306 : vector<2x32xf32>
    %308 = vector.extract_strided_slice %301 {offsets = [0, 32], sizes = [2, 32], strides = [1, 1]} : vector<2x192xf32> to vector<2x32xf32>
    %309 = arith.negf %308 : vector<2x32xf32>
    %310 = math.exp %309 : vector<2x32xf32>
    %cst_58 = arith.constant 1.000000e+00 : f32
    %311 = vector.broadcast %cst_58 : f32 to vector<2x32xf32>
    %312 = arith.addf %311, %310 : vector<2x32xf32>
    %313 = arith.divf %311, %312 : vector<2x32xf32>
    %314 = vector.extract_strided_slice %301 {offsets = [0, 64], sizes = [2, 32], strides = [1, 1]} : vector<2x192xf32> to vector<2x32xf32>
    %315 = math.tanh %314 : vector<2x32xf32>
    %316 = vector.extract_strided_slice %301 {offsets = [0, 96], sizes = [2, 32], strides = [1, 1]} : vector<2x192xf32> to vector<2x32xf32>
    %317 = arith.negf %316 : vector<2x32xf32>
    %318 = math.exp %317 : vector<2x32xf32>
    %cst_59 = arith.constant 1.000000e+00 : f32
    %319 = vector.broadcast %cst_59 : f32 to vector<2x32xf32>
    %320 = arith.addf %319, %318 : vector<2x32xf32>
    %321 = arith.divf %319, %320 : vector<2x32xf32>
    %322 = vector.extract_strided_slice %301 {offsets = [0, 128], sizes = [2, 32], strides = [1, 1]} : vector<2x192xf32> to vector<2x32xf32>
    %323 = arith.negf %322 : vector<2x32xf32>
    %324 = math.exp %323 : vector<2x32xf32>
    %cst_60 = arith.constant 1.000000e+00 : f32
    %325 = vector.broadcast %cst_60 : f32 to vector<2x32xf32>
    %326 = arith.addf %325, %324 : vector<2x32xf32>
    %327 = arith.divf %325, %326 : vector<2x32xf32>
    %328 = vector.extract_strided_slice %301 {offsets = [0, 160], sizes = [2, 32], strides = [1, 1]} : vector<2x192xf32> to vector<2x32xf32>
    %329 = math.tanh %328 : vector<2x32xf32>
    %330 = arith.mulf %307, %315 : vector<2x32xf32>
    %331 = arith.mulf %327, %329 : vector<2x32xf32>
    %332 = vector.broadcast %4 : vector<1x32xf32> to vector<2x32xf32>
    %333 = arith.mulf %330, %332 : vector<2x32xf32>
    %cst_61 = arith.constant dense<0.000000e+00> : vector<2xf32>
    %334 = vector.multi_reduction <add>, %333, %cst_61 [1] : vector<2x32xf32> to vector<2xf32>
    %335 = vector.shape_cast %334 : vector<2xf32> to vector<2x1xf32>
    %336 = vector.broadcast %5 : f32 to vector<2x1xf32>
    %337 = arith.addf %335, %336 : vector<2x1xf32>
    %338 = math.tanh %337 : vector<2x1xf32>
    %339 = vector.broadcast %4 : vector<1x32xf32> to vector<2x32xf32>
    %340 = arith.mulf %331, %339 : vector<2x32xf32>
    %cst_62 = arith.constant dense<0.000000e+00> : vector<2xf32>
    %341 = vector.multi_reduction <add>, %340, %cst_62 [1] : vector<2x32xf32> to vector<2xf32>
    %342 = vector.shape_cast %341 : vector<2xf32> to vector<2x1xf32>
    %343 = vector.broadcast %5 : f32 to vector<2x1xf32>
    %344 = arith.addf %342, %343 : vector<2x1xf32>
    %345 = math.tanh %344 : vector<2x1xf32>
    %346 = arith.maximumf %338, %345 : vector<2x1xf32>
    %347 = arith.subf %338, %346 : vector<2x1xf32>
    %348 = math.exp %347 : vector<2x1xf32>
    %349 = arith.subf %345, %346 : vector<2x1xf32>
    %350 = math.exp %349 : vector<2x1xf32>
    %351 = arith.addf %348, %350 : vector<2x1xf32>
    %352 = tpu.reciprocal %351 {approx = true} : vector<2x1xf32> -> vector<2x1xf32>
    %353 = arith.mulf %348, %352 : vector<2x1xf32>
    %354 = vector.broadcast %353 : vector<2x1xf32> to vector<2x32xf32>
    %355 = arith.mulf %354, %330 : vector<2x32xf32>
    %356 = arith.mulf %350, %352 : vector<2x1xf32>
    %357 = vector.broadcast %356 : vector<2x1xf32> to vector<2x32xf32>
    %358 = arith.mulf %357, %331 : vector<2x32xf32>
    %359 = arith.addf %355, %358 : vector<2x32xf32>
    %360 = arith.mulf %313, %289 : vector<2x32xf32>
    %361 = arith.addf %360, %359 : vector<2x32xf32>
    %362 = math.tanh %361 : vector<2x32xf32>
    %363 = arith.mulf %321, %362 : vector<2x32xf32>
    %364 = arith.index_cast %c4_i32 : i32 to index
    %c0_63 = arith.constant 0 : index
    %c0_64 = arith.constant 0 : index
    %365 = vector.load %arg6[%364, %c0_63, %c0_64] : memref<8x2x32xf32, #tpu.memory_space<vmem>>, vector<1x2x32xf32>
    %366 = vector.shape_cast %365 : vector<1x2x32xf32> to vector<2x32xf32>
    %367 = vector.shape_cast %363 : vector<2x32xf32> to vector<1x2x32xf32>
    tpu.vector_store %arg6[%364, %c0_63, %c0_64], %367 {strides = array<i32>} : memref<8x2x32xf32, #tpu.memory_space<vmem>>, vector<1x2x32xf32>,
    %c5_i32 = arith.constant 5 : i32
    %368 = arith.truncf %363 : vector<2x32xf32> to vector<2x32xbf16>
    %cst_65 = arith.constant dense<0.000000e+00> : vector<2x192xf32>
    %369 = tpu.matmul %368, %3, %cst_65 {dimension_numbers = #tpu.dot_dimension_numbers<[1], [0], [0], [1], [0, 0, 1, 1], [], []>} : vector<2x32xbf16>, vector<32x192xbf16>, vector<2x192xf32> -> vector<2x192xf32>
    %370 = arith.index_cast %c5_i32 : i32 to index
    %c0_66 = arith.constant 0 : index
    %c0_67 = arith.constant 0 : index
    %371 = vector.load %arg2[%370, %c0_66, %c0_67] : memref<8x2x192xf32, #tpu.memory_space<vmem>>, vector<1x2x192xf32>
    %372 = vector.shape_cast %371 : vector<1x2x192xf32> to vector<2x192xf32>
    %373 = arith.addf %372, %369 : vector<2x192xf32>
    %374 = vector.extract_strided_slice %373 {offsets = [0, 0], sizes = [2, 32], strides = [1, 1]} : vector<2x192xf32> to vector<2x32xf32>
    %375 = arith.negf %374 : vector<2x32xf32>
    %376 = math.exp %375 : vector<2x32xf32>
    %cst_68 = arith.constant 1.000000e+00 : f32
    %377 = vector.broadcast %cst_68 : f32 to vector<2x32xf32>
    %378 = arith.addf %377, %376 : vector<2x32xf32>
    %379 = arith.divf %377, %378 : vector<2x32xf32>
    %380 = vector.extract_strided_slice %373 {offsets = [0, 32], sizes = [2, 32], strides = [1, 1]} : vector<2x192xf32> to vector<2x32xf32>
    %381 = arith.negf %380 : vector<2x32xf32>
    %382 = math.exp %381 : vector<2x32xf32>
    %cst_69 = arith.constant 1.000000e+00 : f32
    %383 = vector.broadcast %cst_69 : f32 to vector<2x32xf32>
    %384 = arith.addf %383, %382 : vector<2x32xf32>
    %385 = arith.divf %383, %384 : vector<2x32xf32>
    %386 = vector.extract_strided_slice %373 {offsets = [0, 64], sizes = [2, 32], strides = [1, 1]} : vector<2x192xf32> to vector<2x32xf32>
    %387 = math.tanh %386 : vector<2x32xf32>
    %388 = vector.extract_strided_slice %373 {offsets = [0, 96], sizes = [2, 32], strides = [1, 1]} : vector<2x192xf32> to vector<2x32xf32>
    %389 = arith.negf %388 : vector<2x32xf32>
    %390 = math.exp %389 : vector<2x32xf32>
    %cst_70 = arith.constant 1.000000e+00 : f32
    %391 = vector.broadcast %cst_70 : f32 to vector<2x32xf32>
    %392 = arith.addf %391, %390 : vector<2x32xf32>
    %393 = arith.divf %391, %392 : vector<2x32xf32>
    %394 = vector.extract_strided_slice %373 {offsets = [0, 128], sizes = [2, 32], strides = [1, 1]} : vector<2x192xf32> to vector<2x32xf32>
    %395 = arith.negf %394 : vector<2x32xf32>
    %396 = math.exp %395 : vector<2x32xf32>
    %cst_71 = arith.constant 1.000000e+00 : f32
    %397 = vector.broadcast %cst_71 : f32 to vector<2x32xf32>
    %398 = arith.addf %397, %396 : vector<2x32xf32>
    %399 = arith.divf %397, %398 : vector<2x32xf32>
    %400 = vector.extract_strided_slice %373 {offsets = [0, 160], sizes = [2, 32], strides = [1, 1]} : vector<2x192xf32> to vector<2x32xf32>
    %401 = math.tanh %400 : vector<2x32xf32>
    %402 = arith.mulf %379, %387 : vector<2x32xf32>
    %403 = arith.mulf %399, %401 : vector<2x32xf32>
    %404 = vector.broadcast %4 : vector<1x32xf32> to vector<2x32xf32>
    %405 = arith.mulf %402, %404 : vector<2x32xf32>
    %cst_72 = arith.constant dense<0.000000e+00> : vector<2xf32>
    %406 = vector.multi_reduction <add>, %405, %cst_72 [1] : vector<2x32xf32> to vector<2xf32>
    %407 = vector.shape_cast %406 : vector<2xf32> to vector<2x1xf32>
    %408 = vector.broadcast %5 : f32 to vector<2x1xf32>
    %409 = arith.addf %407, %408 : vector<2x1xf32>
    %410 = math.tanh %409 : vector<2x1xf32>
    %411 = vector.broadcast %4 : vector<1x32xf32> to vector<2x32xf32>
    %412 = arith.mulf %403, %411 : vector<2x32xf32>
    %cst_73 = arith.constant dense<0.000000e+00> : vector<2xf32>
    %413 = vector.multi_reduction <add>, %412, %cst_73 [1] : vector<2x32xf32> to vector<2xf32>
    %414 = vector.shape_cast %413 : vector<2xf32> to vector<2x1xf32>
    %415 = vector.broadcast %5 : f32 to vector<2x1xf32>
    %416 = arith.addf %414, %415 : vector<2x1xf32>
    %417 = math.tanh %416 : vector<2x1xf32>
    %418 = arith.maximumf %410, %417 : vector<2x1xf32>
    %419 = arith.subf %410, %418 : vector<2x1xf32>
    %420 = math.exp %419 : vector<2x1xf32>
    %421 = arith.subf %417, %418 : vector<2x1xf32>
    %422 = math.exp %421 : vector<2x1xf32>
    %423 = arith.addf %420, %422 : vector<2x1xf32>
    %424 = tpu.reciprocal %423 {approx = true} : vector<2x1xf32> -> vector<2x1xf32>
    %425 = arith.mulf %420, %424 : vector<2x1xf32>
    %426 = vector.broadcast %425 : vector<2x1xf32> to vector<2x32xf32>
    %427 = arith.mulf %426, %402 : vector<2x32xf32>
    %428 = arith.mulf %422, %424 : vector<2x1xf32>
    %429 = vector.broadcast %428 : vector<2x1xf32> to vector<2x32xf32>
    %430 = arith.mulf %429, %403 : vector<2x32xf32>
    %431 = arith.addf %427, %430 : vector<2x32xf32>
    %432 = arith.mulf %385, %361 : vector<2x32xf32>
    %433 = arith.addf %432, %431 : vector<2x32xf32>
    %434 = math.tanh %433 : vector<2x32xf32>
    %435 = arith.mulf %393, %434 : vector<2x32xf32>
    %436 = arith.index_cast %c5_i32 : i32 to index
    %c0_74 = arith.constant 0 : index
    %c0_75 = arith.constant 0 : index
    %437 = vector.load %arg6[%436, %c0_74, %c0_75] : memref<8x2x32xf32, #tpu.memory_space<vmem>>, vector<1x2x32xf32>
    %438 = vector.shape_cast %437 : vector<1x2x32xf32> to vector<2x32xf32>
    %439 = vector.shape_cast %435 : vector<2x32xf32> to vector<1x2x32xf32>
    tpu.vector_store %arg6[%436, %c0_74, %c0_75], %439 {strides = array<i32>} : memref<8x2x32xf32, #tpu.memory_space<vmem>>, vector<1x2x32xf32>,
    %c6_i32 = arith.constant 6 : i32
    %440 = arith.truncf %435 : vector<2x32xf32> to vector<2x32xbf16>
    %cst_76 = arith.constant dense<0.000000e+00> : vector<2x192xf32>
    %441 = tpu.matmul %440, %3, %cst_76 {dimension_numbers = #tpu.dot_dimension_numbers<[1], [0], [0], [1], [0, 0, 1, 1], [], []>} : vector<2x32xbf16>, vector<32x192xbf16>, vector<2x192xf32> -> vector<2x192xf32>
    %442 = arith.index_cast %c6_i32 : i32 to index
    %c0_77 = arith.constant 0 : index
    %c0_78 = arith.constant 0 : index
    %443 = vector.load %arg2[%442, %c0_77, %c0_78] : memref<8x2x192xf32, #tpu.memory_space<vmem>>, vector<1x2x192xf32>
    %444 = vector.shape_cast %443 : vector<1x2x192xf32> to vector<2x192xf32>
    %445 = arith.addf %444, %441 : vector<2x192xf32>
    %446 = vector.extract_strided_slice %445 {offsets = [0, 0], sizes = [2, 32], strides = [1, 1]} : vector<2x192xf32> to vector<2x32xf32>
    %447 = arith.negf %446 : vector<2x32xf32>
    %448 = math.exp %447 : vector<2x32xf32>
    %cst_79 = arith.constant 1.000000e+00 : f32
    %449 = vector.broadcast %cst_79 : f32 to vector<2x32xf32>
    %450 = arith.addf %449, %448 : vector<2x32xf32>
    %451 = arith.divf %449, %450 : vector<2x32xf32>
    %452 = vector.extract_strided_slice %445 {offsets = [0, 32], sizes = [2, 32], strides = [1, 1]} : vector<2x192xf32> to vector<2x32xf32>
    %453 = arith.negf %452 : vector<2x32xf32>
    %454 = math.exp %453 : vector<2x32xf32>
    %cst_80 = arith.constant 1.000000e+00 : f32
    %455 = vector.broadcast %cst_80 : f32 to vector<2x32xf32>
    %456 = arith.addf %455, %454 : vector<2x32xf32>
    %457 = arith.divf %455, %456 : vector<2x32xf32>
    %458 = vector.extract_strided_slice %445 {offsets = [0, 64], sizes = [2, 32], strides = [1, 1]} : vector<2x192xf32> to vector<2x32xf32>
    %459 = math.tanh %458 : vector<2x32xf32>
    %460 = vector.extract_strided_slice %445 {offsets = [0, 96], sizes = [2, 32], strides = [1, 1]} : vector<2x192xf32> to vector<2x32xf32>
    %461 = arith.negf %460 : vector<2x32xf32>
    %462 = math.exp %461 : vector<2x32xf32>
    %cst_81 = arith.constant 1.000000e+00 : f32
    %463 = vector.broadcast %cst_81 : f32 to vector<2x32xf32>
    %464 = arith.addf %463, %462 : vector<2x32xf32>
    %465 = arith.divf %463, %464 : vector<2x32xf32>
    %466 = vector.extract_strided_slice %445 {offsets = [0, 128], sizes = [2, 32], strides = [1, 1]} : vector<2x192xf32> to vector<2x32xf32>
    %467 = arith.negf %466 : vector<2x32xf32>
    %468 = math.exp %467 : vector<2x32xf32>
    %cst_82 = arith.constant 1.000000e+00 : f32
    %469 = vector.broadcast %cst_82 : f32 to vector<2x32xf32>
    %470 = arith.addf %469, %468 : vector<2x32xf32>
    %471 = arith.divf %469, %470 : vector<2x32xf32>
    %472 = vector.extract_strided_slice %445 {offsets = [0, 160], sizes = [2, 32], strides = [1, 1]} : vector<2x192xf32> to vector<2x32xf32>
    %473 = math.tanh %472 : vector<2x32xf32>
    %474 = arith.mulf %451, %459 : vector<2x32xf32>
    %475 = arith.mulf %471, %473 : vector<2x32xf32>
    %476 = vector.broadcast %4 : vector<1x32xf32> to vector<2x32xf32>
    %477 = arith.mulf %474, %476 : vector<2x32xf32>
    %cst_83 = arith.constant dense<0.000000e+00> : vector<2xf32>
    %478 = vector.multi_reduction <add>, %477, %cst_83 [1] : vector<2x32xf32> to vector<2xf32>
    %479 = vector.shape_cast %478 : vector<2xf32> to vector<2x1xf32>
    %480 = vector.broadcast %5 : f32 to vector<2x1xf32>
    %481 = arith.addf %479, %480 : vector<2x1xf32>
    %482 = math.tanh %481 : vector<2x1xf32>
    %483 = vector.broadcast %4 : vector<1x32xf32> to vector<2x32xf32>
    %484 = arith.mulf %475, %483 : vector<2x32xf32>
    %cst_84 = arith.constant dense<0.000000e+00> : vector<2xf32>
    %485 = vector.multi_reduction <add>, %484, %cst_84 [1] : vector<2x32xf32> to vector<2xf32>
    %486 = vector.shape_cast %485 : vector<2xf32> to vector<2x1xf32>
    %487 = vector.broadcast %5 : f32 to vector<2x1xf32>
    %488 = arith.addf %486, %487 : vector<2x1xf32>
    %489 = math.tanh %488 : vector<2x1xf32>
    %490 = arith.maximumf %482, %489 : vector<2x1xf32>
    %491 = arith.subf %482, %490 : vector<2x1xf32>
    %492 = math.exp %491 : vector<2x1xf32>
    %493 = arith.subf %489, %490 : vector<2x1xf32>
    %494 = math.exp %493 : vector<2x1xf32>
    %495 = arith.addf %492, %494 : vector<2x1xf32>
    %496 = tpu.reciprocal %495 {approx = true} : vector<2x1xf32> -> vector<2x1xf32>
    %497 = arith.mulf %492, %496 : vector<2x1xf32>
    %498 = vector.broadcast %497 : vector<2x1xf32> to vector<2x32xf32>
    %499 = arith.mulf %498, %474 : vector<2x32xf32>
    %500 = arith.mulf %494, %496 : vector<2x1xf32>
    %501 = vector.broadcast %500 : vector<2x1xf32> to vector<2x32xf32>
    %502 = arith.mulf %501, %475 : vector<2x32xf32>
    %503 = arith.addf %499, %502 : vector<2x32xf32>
    %504 = arith.mulf %457, %433 : vector<2x32xf32>
    %505 = arith.addf %504, %503 : vector<2x32xf32>
    %506 = math.tanh %505 : vector<2x32xf32>
    %507 = arith.mulf %465, %506 : vector<2x32xf32>
    %508 = arith.index_cast %c6_i32 : i32 to index
    %c0_85 = arith.constant 0 : index
    %c0_86 = arith.constant 0 : index
    %509 = vector.load %arg6[%508, %c0_85, %c0_86] : memref<8x2x32xf32, #tpu.memory_space<vmem>>, vector<1x2x32xf32>
    %510 = vector.shape_cast %509 : vector<1x2x32xf32> to vector<2x32xf32>
    %511 = vector.shape_cast %507 : vector<2x32xf32> to vector<1x2x32xf32>
    tpu.vector_store %arg6[%508, %c0_85, %c0_86], %511 {strides = array<i32>} : memref<8x2x32xf32, #tpu.memory_space<vmem>>, vector<1x2x32xf32>,
    %c7_i32 = arith.constant 7 : i32
    %512 = arith.truncf %507 : vector<2x32xf32> to vector<2x32xbf16>
    %cst_87 = arith.constant dense<0.000000e+00> : vector<2x192xf32>
    %513 = tpu.matmul %512, %3, %cst_87 {dimension_numbers = #tpu.dot_dimension_numbers<[1], [0], [0], [1], [0, 0, 1, 1], [], []>} : vector<2x32xbf16>, vector<32x192xbf16>, vector<2x192xf32> -> vector<2x192xf32>
    %514 = arith.index_cast %c7_i32 : i32 to index
    %c0_88 = arith.constant 0 : index
    %c0_89 = arith.constant 0 : index
    %515 = vector.load %arg2[%514, %c0_88, %c0_89] : memref<8x2x192xf32, #tpu.memory_space<vmem>>, vector<1x2x192xf32>
    %516 = vector.shape_cast %515 : vector<1x2x192xf32> to vector<2x192xf32>
    %517 = arith.addf %516, %513 : vector<2x192xf32>
    %518 = vector.extract_strided_slice %517 {offsets = [0, 0], sizes = [2, 32], strides = [1, 1]} : vector<2x192xf32> to vector<2x32xf32>
    %519 = arith.negf %518 : vector<2x32xf32>
    %520 = math.exp %519 : vector<2x32xf32>
    %cst_90 = arith.constant 1.000000e+00 : f32
    %521 = vector.broadcast %cst_90 : f32 to vector<2x32xf32>
    %522 = arith.addf %521, %520 : vector<2x32xf32>
    %523 = arith.divf %521, %522 : vector<2x32xf32>
    %524 = vector.extract_strided_slice %517 {offsets = [0, 32], sizes = [2, 32], strides = [1, 1]} : vector<2x192xf32> to vector<2x32xf32>
    %525 = arith.negf %524 : vector<2x32xf32>
    %526 = math.exp %525 : vector<2x32xf32>
    %cst_91 = arith.constant 1.000000e+00 : f32
    %527 = vector.broadcast %cst_91 : f32 to vector<2x32xf32>
    %528 = arith.addf %527, %526 : vector<2x32xf32>
    %529 = arith.divf %527, %528 : vector<2x32xf32>
    %530 = vector.extract_strided_slice %517 {offsets = [0, 64], sizes = [2, 32], strides = [1, 1]} : vector<2x192xf32> to vector<2x32xf32>
    %531 = math.tanh %530 : vector<2x32xf32>
    %532 = vector.extract_strided_slice %517 {offsets = [0, 96], sizes = [2, 32], strides = [1, 1]} : vector<2x192xf32> to vector<2x32xf32>
    %533 = arith.negf %532 : vector<2x32xf32>
    %534 = math.exp %533 : vector<2x32xf32>
    %cst_92 = arith.constant 1.000000e+00 : f32
    %535 = vector.broadcast %cst_92 : f32 to vector<2x32xf32>
    %536 = arith.addf %535, %534 : vector<2x32xf32>
    %537 = arith.divf %535, %536 : vector<2x32xf32>
    %538 = vector.extract_strided_slice %517 {offsets = [0, 128], sizes = [2, 32], strides = [1, 1]} : vector<2x192xf32> to vector<2x32xf32>
    %539 = arith.negf %538 : vector<2x32xf32>
    %540 = math.exp %539 : vector<2x32xf32>
    %cst_93 = arith.constant 1.000000e+00 : f32
    %541 = vector.broadcast %cst_93 : f32 to vector<2x32xf32>
    %542 = arith.addf %541, %540 : vector<2x32xf32>
    %543 = arith.divf %541, %542 : vector<2x32xf32>
    %544 = vector.extract_strided_slice %517 {offsets = [0, 160], sizes = [2, 32], strides = [1, 1]} : vector<2x192xf32> to vector<2x32xf32>
    %545 = math.tanh %544 : vector<2x32xf32>
    %546 = arith.mulf %523, %531 : vector<2x32xf32>
    %547 = arith.mulf %543, %545 : vector<2x32xf32>
    %548 = vector.broadcast %4 : vector<1x32xf32> to vector<2x32xf32>
    %549 = arith.mulf %546, %548 : vector<2x32xf32>
    %cst_94 = arith.constant dense<0.000000e+00> : vector<2xf32>
    %550 = vector.multi_reduction <add>, %549, %cst_94 [1] : vector<2x32xf32> to vector<2xf32>
    %551 = vector.shape_cast %550 : vector<2xf32> to vector<2x1xf32>
    %552 = vector.broadcast %5 : f32 to vector<2x1xf32>
    %553 = arith.addf %551, %552 : vector<2x1xf32>
    %554 = math.tanh %553 : vector<2x1xf32>
    %555 = vector.broadcast %4 : vector<1x32xf32> to vector<2x32xf32>
    %556 = arith.mulf %547, %555 : vector<2x32xf32>
    %cst_95 = arith.constant dense<0.000000e+00> : vector<2xf32>
    %557 = vector.multi_reduction <add>, %556, %cst_95 [1] : vector<2x32xf32> to vector<2xf32>
    %558 = vector.shape_cast %557 : vector<2xf32> to vector<2x1xf32>
    %559 = vector.broadcast %5 : f32 to vector<2x1xf32>
    %560 = arith.addf %558, %559 : vector<2x1xf32>
    %561 = math.tanh %560 : vector<2x1xf32>
    %562 = arith.maximumf %554, %561 : vector<2x1xf32>
    %563 = arith.subf %554, %562 : vector<2x1xf32>
    %564 = math.exp %563 : vector<2x1xf32>
    %565 = arith.subf %561, %562 : vector<2x1xf32>
    %566 = math.exp %565 : vector<2x1xf32>
    %567 = arith.addf %564, %566 : vector<2x1xf32>
    %568 = tpu.reciprocal %567 {approx = true} : vector<2x1xf32> -> vector<2x1xf32>
    %569 = arith.mulf %564, %568 : vector<2x1xf32>
    %570 = vector.broadcast %569 : vector<2x1xf32> to vector<2x32xf32>
    %571 = arith.mulf %570, %546 : vector<2x32xf32>
    %572 = arith.mulf %566, %568 : vector<2x1xf32>
    %573 = vector.broadcast %572 : vector<2x1xf32> to vector<2x32xf32>
    %574 = arith.mulf %573, %547 : vector<2x32xf32>
    %575 = arith.addf %571, %574 : vector<2x32xf32>
    %576 = arith.mulf %529, %505 : vector<2x32xf32>
    %577 = arith.addf %576, %575 : vector<2x32xf32>
    %578 = math.tanh %577 : vector<2x32xf32>
    %579 = arith.mulf %537, %578 : vector<2x32xf32>
    %580 = arith.index_cast %c7_i32 : i32 to index
    %c0_96 = arith.constant 0 : index
    %c0_97 = arith.constant 0 : index
    %581 = vector.load %arg6[%580, %c0_96, %c0_97] : memref<8x2x32xf32, #tpu.memory_space<vmem>>, vector<1x2x32xf32>
    %582 = vector.shape_cast %581 : vector<1x2x32xf32> to vector<2x32xf32>
    %583 = vector.shape_cast %579 : vector<2x32xf32> to vector<1x2x32xf32>
    tpu.vector_store %arg6[%580, %c0_96, %c0_97], %583 {strides = array<i32>} : memref<8x2x32xf32, #tpu.memory_space<vmem>>, vector<1x2x32xf32>,
    %c8_i32 = arith.constant 8 : i32
    %c0_98 = arith.constant 0 : index
    %c0_99 = arith.constant 0 : index
    %584 = vector.load %arg7[%c0_98, %c0_99] : memref<2x32xf32, #tpu.memory_space<vmem>>, vector<2x32xf32>
    tpu.vector_store %arg7[%c0_98, %c0_99], %579 {strides = array<i32>} : memref<2x32xf32, #tpu.memory_space<vmem>>, vector<2x32xf32>,
    %c0_100 = arith.constant 0 : index
    %c0_101 = arith.constant 0 : index
    %585 = vector.load %arg8[%c0_100, %c0_101] : memref<2x32xf32, #tpu.memory_space<vmem>>, vector<2x32xf32>
    tpu.vector_store %arg8[%c0_100, %c0_101], %577 {strides = array<i32>} : memref<2x32xf32, #tpu.memory_space<vmem>>, vector<2x32xf32>,
    return
  }
  func.func @transform_0(%arg0: i32, %arg1: i32) -> (i32, i32, i32) {
    %c0_i32 = arith.constant 0 : i32
    %c0_i32_0 = arith.constant 0 : i32
    return %arg1, %arg0, %c0_i32 : i32, i32, i32
  }
  func.func @transform_1(%arg0: i32, %arg1: i32) -> (i32, i32) {
    %c0_i32 = arith.constant 0 : i32
    %c0_i32_0 = arith.constant 0 : i32
    %c0_i32_1 = arith.constant 0 : i32
    return %c0_i32, %c0_i32_0 : i32, i32
  }
  func.func @transform_2(%arg0: i32, %arg1: i32) -> (i32, i32) {
    %c0_i32 = arith.constant 0 : i32
    %c0_i32_0 = arith.constant 0 : i32
    %c0_i32_1 = arith.constant 0 : i32
    return %c0_i32, %c0_i32_0 : i32, i32
  }
  func.func @transform_3(%arg0: i32, %arg1: i32) -> (i32, i32) {
    %c0_i32 = arith.constant 0 : i32
    %c0_i32_0 = arith.constant 0 : i32
    %c0_i32_1 = arith.constant 0 : i32
    return %c0_i32, %c0_i32_0 : i32, i32
  }
  func.func @transform_4(%arg0: i32, %arg1: i32) -> (i32, i32, i32) {
    %c0_i32 = arith.constant 0 : i32
    %c0_i32_0 = arith.constant 0 : i32
    return %arg1, %arg0, %c0_i32 : i32, i32, i32
  }
}

</mosaic_0001>

<bundles_post_ra>
// kernel: tpu_custom_call.1
= control target key start
LH: loop header
LB: loop body
LE: loop exit
PB: predicated region body
PF: predicated region fallthrough
CT: control target
= control target key end

     0   :  { %10 = vsyncpa [#allocation6], 0  ;;  %s2009_s0 = inlined_call_operand.hbm [shape: f32[8,2,192], index: 0, kind: input, shape index: {}]   ;;  %s2010_s1 = inlined_call_operand.hbm [shape: bf16[32,192], index: 1, kind: input, shape index: {}]   ;;  %s2011_s2 = inlined_call_operand.hbm [shape: f32[1,32], index: 2, kind: input, shape index: {}]   ;;  %s2012_s3 = inlined_call_operand.<no memory space> [shape: f32[1,1], index: 3, kind: input, shape index: {}]   ;;  %s2013_s4 = inlined_call_operand.hbm [shape: f32[8,2,32], index: 4, kind: output, shape index: {}]  }
   0x1   :  { %11 = vsyncpa [#allocation9], 0 }
   0x2   :  { %12 = vsyncpa [#allocation7], 0  ;;  %s1653_s15 = smov [#allocation8]   ;;  %s1559_s19 = scalar_lea.hbm %s2010_s1, 512 }
   0x3   :  { %s30_s16 = sshll.u32 %s1653_s15, 4  ;;  %p1560_p0 = scmp.ne.s32.totalorder %s2010_s1, %s1559_s19  ;;  %s31_s16 = int_to_ptr.vmem [resolvable:$true] %s30_s16 }
   0x4   :  { %p1563_p1 = scmp.lt.u32.totalorder %s1559_s19, %s2010_s1 }
   0x6   :  { %p1565_p2 = pnand %p1563_p1, %p1560_p0 }
   0x8   :  { %1568 = shalt.err (!%p1565_p2)
}
   0x9   :  { %s1569_s24 = scalar_lea.vmem %s31_s16, 512  ;;  %p1574_p4 = scmp.lt.s32.totalorder %s31_s16, %s31_s16 }
   0xa   :  { %p1570_p3 = scmp.ne.s32.totalorder %s31_s16, %s1569_s24  ;;  %p1575_p5 = scmp.lt.s32.totalorder %s1569_s24, %s1569_s24 }
   0xc   :  { %p1576_p6 = por %p1575_p5, %p1574_p4 }
   0xe   :  { %p1577_p7 = pnand %p1576_p6, %p1570_p3 }
  0x10   :  { %1580 = shalt.err (!%p1577_p7)
}
  0x11   :  { %s1654_s25 = smov 128   ;;  %s1655_s26 = smov 8  }
  0x12   :  { %36 = dma.hbm_to_vmem [thread:$0]  %s2010_s1, 512, %s31_s16, [#allocation9], %s1654_s25, %s1654_s25, %s1655_s26  }
  0x13   :  { %s1656_s29 = smov [#allocation5]   ;;  %s1581_s7 = scalar_lea.hbm %s2009_s0, 512 }
  0x14   :  { %s18_s30 = sshll.u32 %s1656_s29, 4  ;;  %p1582_p8 = scmp.ne.s32.totalorder %s2009_s0, %s1581_s7  ;;  %s19_s30 = int_to_ptr.vmem [resolvable:$true] %s18_s30 }
  0x15   :  { %p1585_p9 = scmp.lt.u32.totalorder %s1581_s7, %s2009_s0 }
  0x17   :  { %p1587_p10 = pnand %p1585_p9, %p1582_p8 }
  0x19   :  { %1590 = shalt.err (!%p1587_p10)
}
  0x1a   :  { %s1591_s12 = scalar_lea.vmem %s19_s30, 512  ;;  %p1596_p12 = scmp.lt.s32.totalorder %s19_s30, %s19_s30 }
  0x1b   :  { %p1592_p11 = scmp.ne.s32.totalorder %s19_s30, %s1591_s12  ;;  %p1597_p13 = scmp.lt.s32.totalorder %s1591_s12, %s1591_s12 }
  0x1d   :  { %p1598_p0 = por %p1597_p13, %p1596_p12 }
  0x1f   :  { %p1599_p1 = pnand %p1598_p0, %p1592_p11 }
  0x21   :  { %1602 = shalt.err (!%p1599_p1)
}
  0x22   :  { %s1657_s1 = smov 64   ;;  %s1658_s13 = smov 4  }
  0x23   :  { %24 = dma.hbm_to_vmem [thread:$0]  %s2009_s0, 512, %s19_s30, [#allocation6], %s1657_s1, %s1657_s1, %s1658_s13  }
  0x24   :  { %s1659_s16 = smov [#allocation10]   ;;  %s1603_s20 = scalar_lea.hbm %s2011_s2, 16 }
  0x25   :  { %s43_s17 = sshll.u32 %s1659_s16, 4  ;;  %p1604_p2 = scmp.ne.s32.totalorder %s2011_s2, %s1603_s20  ;;  %s44_s17 = int_to_ptr.vmem [resolvable:$true] %s43_s17 }
  0x26   :  { %p1607_p3 = scmp.lt.u32.totalorder %s1603_s20, %s2011_s2 }
  0x28   :  { %p1609_p4 = pnand %p1607_p3, %p1604_p2 }
  0x2a   :  { %1612 = shalt.err (!%p1609_p4)
}
  0x2b   :  { %s1613_s25 = scalar_lea.vmem %s44_s17, 16  ;;  %s1617_s0 = scalar_lea.vmem %s44_s17, 32 }
  0x2c   :  { %p1614_p5 = scmp.ne.s32.totalorder %s44_s17, %s1613_s25  ;;  %p1618_p6 = scmp.lt.s32.totalorder %s44_s17, %s44_s17 }
  0x2d   :  { %p1619_p7 = scmp.lt.s32.totalorder %s1617_s0, %s1613_s25 }
  0x2f   :  { %p1620_p8 = por %p1619_p7, %p1618_p6 }
  0x31   :  { %p1621_p9 = pnand %p1620_p8, %p1614_p5 }
  0x33   :  { %1624 = shalt.err (!%p1621_p9)
}
  0x34   :  { %46 = dma.hbm_to_vmem [thread:$0]  %s2011_s2, 16, %s44_s17, [#allocation9]  }
  0x35   :  { %1647 = dma.done.wait [#allocation6], 512  }
  0x36   :  { %1648 = vsyncadd [#allocation6], 4294966784 }
  0x37   :  { %1649 = dma.done.wait [#allocation9], 528  }
  0x38   :  { %1650 = vsyncadd [#allocation9], 4294966768  ;;  %vm63_vm0 = vcmask 254976   ;;  %v1660_v0 = vmov 0   ;;  %v1661_v1 = vmov 0.0   ;;  %vm95_vm1 = vcmask 261120  }
  0x39   :  { %131 = vmatprep.mubr.bf16.mxu0 %v1660_v0  ;;  %64 = vst.msk [vmem:[#allocation2] sm:$0x3] %vm63_vm0, %v1661_v1  ;;  %65 = vst.msk [vmem:[#allocation3] sm:$0x3] %vm63_vm0, %v1661_v1  ;;  %295 = vmatprep.mubr.bf16.mxu1 %v1660_v0  ;;  %v1734_v2 = vld [vmem:[#allocation8 + $0x4] ss:$8 sps:$4 sm:$0xff]   ;;  %v147_v10 = vlaneseq  ;;  %v1773_v44 = vstv %s2012_s3 }
  0x3a   :  { %v1736_v3 = vld [vmem:[#allocation8] ss:$8 sps:$4 sm:$0xff]   ;;  %99 = vmatprep.subr.bf16.mxu0 %v1734_v2  ;;  %v1739_v4 = vld [vmem:[#allocation8 + $0x14] ss:$8 sps:$4 sm:$0xff]   ;;  %263 = vmatprep.subr.bf16.mxu1 %v1734_v2  ;;  %v1743_v5 = vld [vmem:[#allocation8 + $0x10] ss:$8 sps:$4 sm:$0xff]  }
  0x3b   :  { %100 = vmatpush1.bf16.msra.mxu0 %v1736_v3  ;;  %264 = vmatpush1.bf16.msra.mxu1 %v1736_v3  ;;  %v1662_v8 = vmov 1983009808   ;;  %v148_v12 = vshrl.u32 %v147_v10, 7  ;;  %v140_v18 = vld [vmem:[#allocation5] sm:$0xf]  ;;  %s1663_s2 = smov 96  }
  0x3c   :  { %101 = vmatprep.subr.bf16.mxu0 %v1739_v4  ;;  %265 = vmatprep.subr.bf16.mxu1 %v1739_v4  ;;  %v145_v9 = vunpack.c.l.s4 %v1662_v8  ;;  %s1664_s28 = smov 32   ;;  %v1764_v35 = vld [vmem:[#allocation10] ss:$0 sm:$0xff]  ;;  %s1665_s3 = smov [#allocation11]  }
  0x3d   :  { %s1303_s5 = sshll.u32 %s1665_s3, 4  ;;  %s1304_s5 = int_to_ptr.vmem [resolvable:$true] %s1303_s5 }
  0x3e   :  { %v146_v11 = vunpack.c.0.s8 %v145_v9  ;;  %s1625_s6 = scalar_lea.vmem %s1304_s5, 256  ;;  %p1630_p11 = scmp.lt.s32.totalorder %s1304_s5, %s1304_s5 }
  0x3f   :  { %102 = vmatpush1.bf16.msra.mxu0 %v1743_v5  ;;  %266 = vmatpush1.bf16.msra.mxu1 %v1743_v5  ;;  %p1626_p10 = scmp.ne.s32.totalorder %s1304_s5, %s1625_s6  ;;  %p1631_p12 = scmp.lt.s32.totalorder %s1625_s6, %s1625_s6 }
  0x40   :  { %v72_v6 = vld [vmem:[#allocation2] sm:$0x3]  ;;  %410 = vmatprep.subr.bf16.mxu0 %v1734_v2  ;;  %557 = vmatprep.subr.bf16.mxu1 %v1734_v2  ;;  %v1758_v14 = vsub.s32 %v146_v11, %v148_v12  ;;  %v1324_v23 = vld.sshfl [vmem:[#allocation3] sm:$0x3 pattern:$0x76325410] }
  0x41   :  { %v74_v7 = vpack.c.bf16 %v72_v6, %v72_v6  ;;  %p1632_p13 = por %p1631_p12, %p1630_p11 }
  0x43   :  { %1320 = vmatmul.mubr.msk.bf16.vlgmr.msra.gmra.mrb[0].mxu0 %vm95_vm1, %v74_v7  ;;  %p1633_p0 = pnand %p1632_p13, %p1626_p10 }
  0x44   :  { %411 = vmatpush1.bf16.msra.mxu0 %v1736_v3  ;;  %442 = vmatprep.mubr.bf16.mxu0 %v1660_v0 }
  0x45   :  { %412 = vmatprep.subr.bf16.mxu0 %v1739_v4 }
  0x48   :  { %413 = vmatpush1.bf16.msra.mxu0 %v1743_v5 }
  0x49   :  { %704 = vmatprep.subr.bf16.mxu0 %v1734_v2 }
 0x116   :  { %v133_v13 = vpop.f32.mrb[0].mxu0 }
 0x117   :  { %v135_v15 = vpop.f32.mrb[1].mxu0 }
 0x118   :  { %v143_v16 = vcombine.low %v133_v13, %v135_v15  ;;  %v137_v17 = vpop.f32.mrb[2].mxu0 }
 0x119   :  { %v138_v19 = vpop.f32.mrb[3].mxu0 }
 0x11a   :  { %v150_v20 = vrot.slane %v143_v16, %v1758_v14 }
 0x11c   :  { %v152_v21 = vadd.f32 %v150_v20, %v140_v18 }
 0x11e   :  { %169 = vrot.lane.b32.xlu0 %v152_v21, %s1663_s2  ;;  %1366 = vtanh.f32 %v152_v21  ;;  %v161_v24 = vrot.slane %v152_v21, 2  ;;  %v1321_v25 = vmul.f32 -1.442695, %v152_v21  ;;  %v305_v21 = vld [vmem:[#allocation5 + $0x4] sm:$0xf] }
 0x120   :  { %v1322_v26 = vmul.f32 -1.442695, %v161_v24  ;;  %1368 = vpow2.f32 %v1321_v25 }
 0x122   :  { %1370 = vpow2.f32 %v1322_v26 }
 0x128   :  { %v1367_v22 = vpop.eup %1366 }
 0x129   :  { %175 = vrot.lane.b32.xlu0 %v1367_v22, %s1657_s1 }
 0x12a   :  { %v1369_v27 = vpop.eup %1368 }
 0x12b   :  { %v156_v29 = vadd.f32 1.0, %v1369_v27 }
 0x12c   :  { %v1371_v28 = vpop.eup %1370 }
 0x12d   :  { %222 = vrot.lane.b32.xlu0 %v1324_v23, %s1664_s28  ;;  %v166_v30 = vadd.f32 1.0, %v1371_v28  ;;  %1372 = vrcp.f32 %v156_v29 }
 0x12f   :  { %1374 = vrcp.f32 %v166_v30 }
 0x137   :  { %v1373_v33 = vpop.eup %1372 }
 0x139   :  { %v1375_v36 = vpop.eup %1374 }
 0x190   :  { %v170_v31 = vpop.permute.xlu0 %169 }
 0x191   :  { %v171_v32 = vrot.slane %v170_v31, 2 }
 0x193   :  { %1376 = vtanh.f32 %v171_v32 }
 0x19b   :  { %v176_v34 = vpop.permute.xlu0 %175 }
 0x19c   :  { %v178_v37 = vmul.f32 %v1373_v33, %v176_v34 }
 0x19d   :  { %v1377_v38 = vpop.eup %1376 }
 0x19e   :  { %v186_v39 = vmul.f32 %v1764_v35, %v178_v37  ;;  %v179_v40 = vmul.f32 %v1377_v38, %v1375_v36 }
 0x19f   :  { %v223_v7 = vpop.permute.xlu0 %222 }
 0x1a0   :  { %v188_v41 = vsel %vm63_vm0, %v186_v39, 0.0  ;;  %v194_v42 = vmul.f32 %v1764_v35, %v179_v40  ;;  %v225_v8 = vmul.f32 %v1373_v33, %v223_v7 }
 0x1a1   :  { %189 = vadd.xlane.f32.xlu1 %v188_v41 }
 0x1a2   :  { %v195_v43 = vsel %vm63_vm0, %v194_v42, 0.0 }
 0x1a5   :  { %196 = vadd.xlane.f32.xlu1 %v195_v43 }
 0x22e   :  { %v190_v45 = vpop.xlane.xlu1 %189 }
 0x22f   :  { %v192_v46 = vadd.f32 %v1773_v44, %v190_v45 }
 0x231   :  { %1378 = vtanh.f32 %v192_v46 }
 0x232   :  { %v197_v47 = vpop.xlane.xlu1 %196 }
 0x233   :  { %v198_v48 = vadd.f32 %v197_v47, %v1773_v44 }
 0x235   :  { %1380 = vtanh.f32 %v198_v48 }
 0x23b   :  { %v1379_v49 = vpop.eup %1378 }
 0x23f   :  { %v1381_v50 = vpop.eup %1380 }
 0x240   :  { %v200_v51 = vmax.f32 %v1379_v49, %v1381_v50 }
 0x242   :  { %v201_v52 = vsub.f32 %v1379_v49, %v200_v51  ;;  %v204_v53 = vsub.f32 %v1381_v50, %v200_v51 }
 0x244   :  { %v202_v54 = vmul.f32 1.442695, %v201_v52  ;;  %v205_v55 = vmul.f32 1.442695, %v204_v53 }
 0x246   :  { %1382 = vpow2.f32 %v202_v54 }
 0x247   :  { %1384 = vpow2.f32 %v205_v55 }
 0x250   :  { %v1383_v56 = vpop.eup %1382 }
 0x251   :  { %v1385_v57 = vpop.eup %1384 }
 0x252   :  { %v207_v58 = vadd.f32 %v1385_v57, %v1383_v56 }
 0x254   :  { %1386 = vrcp.f32 %v207_v58 }
 0x25e   :  { %v1387_v59 = vpop.eup %1386 }
 0x25f   :  { %v209_v60 = vmul.f32 %v1387_v59, %v1383_v56  ;;  %v211_v61 = vmul.f32 %v1387_v59, %v1385_v57 }
 0x261   :  { %v210_v62 = vmul.f32 %v209_v60, %v178_v37  ;;  %v212_v63 = vmul.f32 %v211_v61, %v179_v40 }
 0x263   :  { %v213_v1 = vadd.f32 %v212_v63, %v210_v62 }
 0x265   :  { %v233_v6 = vrot.slane %v213_v1, %v1758_v14 }
 0x267   :  { %234 = vrot.lane.b32.xlu1 %v233_v6, %s1664_s28 }
 0x2d9   :  { %v235_v9 = vpop.permute.xlu1 %234 }
 0x2da   :  { %v1779_v10 = vadd.f32 %v235_v9, %v225_v8 }
 0x2dc   :  { %1388 = vtanh.f32 %v1779_v10 }
 0x2e6   :  { %v1389_v11 = vpop.eup %1388 }
 0x2e7   :  { %240 = vrot.lane.b32.xlu0 %v1389_v11, %s1657_s1 }
 0x359   :  { %v241_v12 = vpop.permute.xlu0 %240 }
 0x35a   :  { %v1783_v13 = vmul.f32 %v1373_v33, %v241_v12 }
 0x35c   :  { %v256_v15 = vpack.c.bf16 %v1783_v13, %v1783_v13 }
 0x35e   :  { %258 = vrot.lane.b32.xlu0 %v256_v15, %s1664_s28 }
 0x3d0   :  { %v259_v16 = vpop.permute.xlu0 %258 }
 0x3d1   :  { %1325 = vmatmul.mubr.msk.bf16.vlgmr.msra.gmra.mrb[0].mxu1 %vm95_vm1, %v259_v16 }
 0x3d2   :  { %558 = vmatpush1.bf16.msra.mxu1 %v1736_v3  ;;  %589 = vmatprep.mubr.bf16.mxu1 %v1660_v0 }
 0x3d3   :  { %559 = vmatprep.subr.bf16.mxu1 %v1739_v4 }
 0x3d6   :  { %560 = vmatpush1.bf16.msra.mxu1 %v1743_v5 }
 0x3d7   :  { %851 = vmatprep.subr.bf16.mxu1 %v1734_v2 }
 0x4a4   :  { %v297_v17 = vpop.f32.mrb[0].mxu1 }
 0x4a5   :  { %v299_v18 = vpop.f32.mrb[1].mxu1 }
 0x4a6   :  { %v308_v19 = vcombine.low %v297_v17, %v299_v18  ;;  %v301_v20 = vpop.f32.mrb[2].mxu1 }
 0x4a7   :  { %v302_v22 = vpop.f32.mrb[3].mxu1 }
 0x4a8   :  { %v315_v23 = vrot.slane %v308_v19, %v1758_v14 }
 0x4aa   :  { %v317_v24 = vadd.f32 %v315_v23, %v305_v21  ;;  %v452_v23 = vld [vmem:[#allocation5 + $0x8] sm:$0xf] }
 0x4ac   :  { %334 = vrot.lane.b32.xlu0 %v317_v24, %s1663_s2  ;;  %1390 = vtanh.f32 %v317_v24  ;;  %v326_v26 = vrot.slane %v317_v24, 2  ;;  %v1326_v27 = vmul.f32 -1.442695, %v317_v24 }
 0x4ae   :  { %v1327_v28 = vmul.f32 -1.442695, %v326_v26  ;;  %1392 = vpow2.f32 %v1326_v27 }
 0x4b0   :  { %1394 = vpow2.f32 %v1327_v28 }
 0x4b6   :  { %v1391_v25 = vpop.eup %1390 }
 0x4b7   :  { %340 = vrot.lane.b32.xlu0 %v1391_v25, %s1657_s1 }
 0x4b8   :  { %v1393_v29 = vpop.eup %1392 }
 0x4b9   :  { %v321_v31 = vadd.f32 1.0, %v1393_v29 }
 0x4ba   :  { %v1395_v30 = vpop.eup %1394 }
 0x4bb   :  { %v331_v32 = vadd.f32 1.0, %v1395_v30  ;;  %1396 = vrcp.f32 %v321_v31 }
 0x4bd   :  { %1398 = vrcp.f32 %v331_v32 }
 0x4c5   :  { %v1397_v36 = vpop.eup %1396 }
 0x4c6   :  { %v371_v9 = vmul.f32 %v1397_v36, %v1779_v10 }
 0x4c7   :  { %v1399_v38 = vpop.eup %1398 }
 0x51e   :  { %v335_v33 = vpop.permute.xlu0 %334 }
 0x51f   :  { %v336_v34 = vrot.slane %v335_v33, 2 }
 0x521   :  { %1400 = vtanh.f32 %v336_v34 }
 0x529   :  { %v341_v37 = vpop.permute.xlu0 %340 }
 0x52a   :  { %v343_v39 = vmul.f32 %v1397_v36, %v341_v37 }
 0x52b   :  { %v1401_v40 = vpop.eup %1400 }
 0x52c   :  { %v345_v41 = vmul.f32 %v1764_v35, %v343_v39  ;;  %v344_v42 = vmul.f32 %v1401_v40, %v1399_v38 }
 0x52e   :  { %v346_v43 = vsel %vm63_vm0, %v345_v41, 0.0  ;;  %v351_v45 = vmul.f32 %v1764_v35, %v344_v42 }
 0x52f   :  { %347 = vadd.xlane.f32.xlu1 %v346_v43 }
 0x530   :  { %v352_v46 = vsel %vm63_vm0, %v351_v45, 0.0 }
 0x531   :  { %353 = vadd.xlane.f32.xlu0 %v352_v46 }
 0x5bc   :  { %v348_v47 = vpop.xlane.xlu1 %347 }
 0x5bd   :  { %v349_v48 = vadd.f32 %v348_v47, %v1773_v44 }
 0x5be   :  { %v354_v49 = vpop.xlane.xlu0 %353 }
 0x5bf   :  { %v355_v50 = vadd.f32 %v354_v49, %v1773_v44  ;;  %1402 = vtanh.f32 %v349_v48 }
 0x5c1   :  { %1404 = vtanh.f32 %v355_v50 }
 0x5c9   :  { %v1403_v51 = vpop.eup %1402 }
 0x5cb   :  { %v1405_v52 = vpop.eup %1404 }
 0x5cc   :  { %v357_v53 = vmax.f32 %v1403_v51, %v1405_v52 }
 0x5ce   :  { %v358_v54 = vsub.f32 %v1403_v51, %v357_v53  ;;  %v361_v55 = vsub.f32 %v1405_v52, %v357_v53 }
 0x5d0   :  { %v359_v56 = vmul.f32 1.442695, %v358_v54  ;;  %v362_v57 = vmul.f32 1.442695, %v361_v55 }
 0x5d2   :  { %1406 = vpow2.f32 %v359_v56 }
 0x5d3   :  { %1408 = vpow2.f32 %v362_v57 }
 0x5dc   :  { %v1407_v58 = vpop.eup %1406 }
 0x5dd   :  { %v1409_v59 = vpop.eup %1408 }
 0x5de   :  { %v364_v60 = vadd.f32 %v1409_v59, %v1407_v58 }
 0x5e0   :  { %1410 = vrcp.f32 %v364_v60 }
 0x5ea   :  { %v1411_v61 = vpop.eup %1410 }
 0x5eb   :  { %v366_v62 = vmul.f32 %v1411_v61, %v1407_v58  ;;  %v368_v63 = vmul.f32 %v1411_v61, %v1409_v59 }
 0x5ed   :  { %v367_v1 = vmul.f32 %v366_v62, %v343_v39  ;;  %v369_v6 = vmul.f32 %v368_v63, %v344_v42 }
 0x5ef   :  { %v370_v7 = vadd.f32 %v369_v6, %v367_v1 }
 0x5f1   :  { %v379_v8 = vrot.slane %v370_v7, %v1758_v14 }
 0x5f3   :  { %380 = vrot.lane.b32.xlu0 %v379_v8, %s1664_s28 }
 0x665   :  { %v381_v11 = vpop.permute.xlu0 %380 }
 0x666   :  { %v1806_v12 = vadd.f32 %v381_v11, %v371_v9 }
 0x668   :  { %1412 = vtanh.f32 %v1806_v12 }
 0x672   :  { %v1413_v15 = vpop.eup %1412 }
 0x673   :  { %386 = vrot.lane.b32.xlu1 %v1413_v15, %s1657_s1 }
 0x6e5   :  { %v387_v16 = vpop.permute.xlu1 %386 }
 0x6e6   :  { %v1810_v17 = vmul.f32 %v1397_v36, %v387_v16 }
 0x6e8   :  { %v403_v18 = vpack.c.bf16 %v1810_v17, %v1810_v17 }
 0x6ea   :  { %405 = vrot.lane.b32.xlu1 %v403_v18, %s1664_s28 }
 0x75c   :  { %v406_v19 = vpop.permute.xlu1 %405 }
 0x75d   :  { %1328 = vmatmul.mubr.msk.bf16.vlgmr.msra.gmra.mrb[4].mxu0 %vm95_vm1, %v406_v19 }
 0x75e   :  { %705 = vmatpush1.bf16.msra.mxu0 %v1736_v3  ;;  %736 = vmatprep.mubr.bf16.mxu0 %v1660_v0 }
 0x75f   :  { %706 = vmatprep.subr.bf16.mxu0 %v1739_v4 }
 0x762   :  { %707 = vmatpush1.bf16.msra.mxu0 %v1743_v5 }
 0x763   :  { %998 = vmatprep.subr.bf16.mxu0 %v1734_v2 }
 0x830   :  { %v444_v10 = vpop.f32.mrb[4].mxu0 }
 0x831   :  { %v446_v20 = vpop.f32.mrb[5].mxu0 }
 0x832   :  { %v455_v21 = vcombine.low %v444_v10, %v446_v20  ;;  %v448_v22 = vpop.f32.mrb[6].mxu0 }
 0x833   :  { %v449_v24 = vpop.f32.mrb[7].mxu0 }
 0x834   :  { %v462_v25 = vrot.slane %v455_v21, %v1758_v14 }
 0x836   :  { %v464_v26 = vadd.f32 %v462_v25, %v452_v23 }
 0x838   :  { %481 = vrot.lane.b32.xlu0 %v464_v26, %s1663_s2  ;;  %1414 = vtanh.f32 %v464_v26  ;;  %v473_v28 = vrot.slane %v464_v26, 2  ;;  %v1329_v29 = vmul.f32 -1.442695, %v464_v26  ;;  %v599_v26 = vld [vmem:[#allocation5 + $0xc] sm:$0xf] }
 0x83a   :  { %v1330_v30 = vmul.f32 -1.442695, %v473_v28  ;;  %1416 = vpow2.f32 %v1329_v29 }
 0x83c   :  { %1418 = vpow2.f32 %v1330_v30 }
 0x842   :  { %v1415_v27 = vpop.eup %1414 }
 0x843   :  { %487 = vrot.lane.b32.xlu1 %v1415_v27, %s1657_s1 }
 0x844   :  { %v1417_v31 = vpop.eup %1416 }
 0x845   :  { %v468_v33 = vadd.f32 1.0, %v1417_v31 }
 0x846   :  { %v1419_v32 = vpop.eup %1418 }
 0x847   :  { %v478_v34 = vadd.f32 1.0, %v1419_v32  ;;  %1420 = vrcp.f32 %v468_v33 }
 0x849   :  { %1422 = vrcp.f32 %v478_v34 }
 0x851   :  { %v1421_v38 = vpop.eup %1420 }
 0x852   :  { %v518_v15 = vmul.f32 %v1421_v38, %v1806_v12 }
 0x853   :  { %v1423_v40 = vpop.eup %1422 }
 0x8aa   :  { %v482_v36 = vpop.permute.xlu0 %481 }
 0x8ab   :  { %v483_v37 = vrot.slane %v482_v36, 2 }
 0x8ad   :  { %1424 = vtanh.f32 %v483_v37 }
 0x8b5   :  { %v488_v39 = vpop.permute.xlu1 %487 }
 0x8b6   :  { %v490_v41 = vmul.f32 %v1421_v38, %v488_v39 }
 0x8b7   :  { %v1425_v42 = vpop.eup %1424 }
 0x8b8   :  { %v492_v43 = vmul.f32 %v1764_v35, %v490_v41  ;;  %v491_v45 = vmul.f32 %v1425_v42, %v1423_v40 }
 0x8ba   :  { %v493_v46 = vsel %vm63_vm0, %v492_v43, 0.0  ;;  %v498_v47 = vmul.f32 %v1764_v35, %v491_v45 }
 0x8bb   :  { %494 = vadd.xlane.f32.xlu0 %v493_v46 }
 0x8bc   :  { %v499_v48 = vsel %vm63_vm0, %v498_v47, 0.0 }
 0x8bd   :  { %500 = vadd.xlane.f32.xlu1 %v499_v48 }
 0x948   :  { %v495_v49 = vpop.xlane.xlu0 %494 }
 0x949   :  { %v496_v50 = vadd.f32 %v495_v49, %v1773_v44 }
 0x94a   :  { %v501_v51 = vpop.xlane.xlu1 %500 }
 0x94b   :  { %v502_v52 = vadd.f32 %v501_v51, %v1773_v44  ;;  %1426 = vtanh.f32 %v496_v50 }
 0x94d   :  { %1428 = vtanh.f32 %v502_v52 }
 0x955   :  { %v1427_v53 = vpop.eup %1426 }
 0x957   :  { %v1429_v54 = vpop.eup %1428 }
 0x958   :  { %v504_v55 = vmax.f32 %v1427_v53, %v1429_v54 }
 0x95a   :  { %v505_v56 = vsub.f32 %v1427_v53, %v504_v55  ;;  %v508_v57 = vsub.f32 %v1429_v54, %v504_v55 }
 0x95c   :  { %v506_v58 = vmul.f32 1.442695, %v505_v56  ;;  %v509_v59 = vmul.f32 1.442695, %v508_v57 }
 0x95e   :  { %1430 = vpow2.f32 %v506_v58 }
 0x95f   :  { %1432 = vpow2.f32 %v509_v59 }
 0x968   :  { %v1431_v60 = vpop.eup %1430 }
 0x969   :  { %v1433_v61 = vpop.eup %1432 }
 0x96a   :  { %v511_v62 = vadd.f32 %v1433_v61, %v1431_v60 }
 0x96c   :  { %1434 = vrcp.f32 %v511_v62 }
 0x976   :  { %v1435_v63 = vpop.eup %1434 }
 0x977   :  { %v513_v1 = vmul.f32 %v1435_v63, %v1431_v60  ;;  %v515_v6 = vmul.f32 %v1435_v63, %v1433_v61 }
 0x979   :  { %v514_v7 = vmul.f32 %v513_v1, %v490_v41  ;;  %v516_v8 = vmul.f32 %v515_v6, %v491_v45 }
 0x97b   :  { %v517_v9 = vadd.f32 %v516_v8, %v514_v7 }
 0x97d   :  { %v526_v11 = vrot.slane %v517_v9, %v1758_v14 }
 0x97f   :  { %527 = vrot.lane.b32.xlu0 %v526_v11, %s1664_s28 }
 0x9f1   :  { %v528_v16 = vpop.permute.xlu0 %527 }
 0x9f2   :  { %v1833_v18 = vadd.f32 %v528_v16, %v518_v15 }
 0x9f4   :  { %1436 = vtanh.f32 %v1833_v18 }
 0x9fe   :  { %v1437_v19 = vpop.eup %1436 }
 0x9ff   :  { %533 = vrot.lane.b32.xlu1 %v1437_v19, %s1657_s1 }
 0xa71   :  { %v534_v10 = vpop.permute.xlu1 %533 }
 0xa72   :  { %v1837_v20 = vmul.f32 %v1421_v38, %v534_v10 }
 0xa74   :  { %v550_v21 = vpack.c.bf16 %v1837_v20, %v1837_v20 }
 0xa76   :  { %552 = vrot.lane.b32.xlu0 %v550_v21, %s1664_s28 }
 0xae8   :  { %v553_v22 = vpop.permute.xlu0 %552 }
 0xae9   :  { %1331 = vmatmul.mubr.msk.bf16.vlgmr.msra.gmra.mrb[4].mxu1 %vm95_vm1, %v553_v22 }
 0xaea   :  { %852 = vmatpush1.bf16.msra.mxu1 %v1736_v3  ;;  %883 = vmatprep.mubr.bf16.mxu1 %v1660_v0 }
 0xaeb   :  { %853 = vmatprep.subr.bf16.mxu1 %v1739_v4 }
 0xaee   :  { %854 = vmatpush1.bf16.msra.mxu1 %v1743_v5 }
 0xaef   :  { %1145 = vmatprep.subr.bf16.mxu1 %v1734_v2 }
 0xbbc   :  { %v591_v12 = vpop.f32.mrb[4].mxu1 }
 0xbbd   :  { %v593_v23 = vpop.f32.mrb[5].mxu1 }
 0xbbe   :  { %v602_v24 = vcombine.low %v591_v12, %v593_v23  ;;  %v595_v25 = vpop.f32.mrb[6].mxu1 }
 0xbbf   :  { %v596_v27 = vpop.f32.mrb[7].mxu1 }
 0xbc0   :  { %v609_v28 = vrot.slane %v602_v24, %v1758_v14 }
 0xbc2   :  { %v611_v29 = vadd.f32 %v609_v28, %v599_v26 }
 0xbc4   :  { %628 = vrot.lane.b32.xlu1 %v611_v29, %s1663_s2  ;;  %1438 = vtanh.f32 %v611_v29  ;;  %v620_v31 = vrot.slane %v611_v29, 2  ;;  %v1332_v32 = vmul.f32 -1.442695, %v611_v29  ;;  %v746_v29 = vld [vmem:[#allocation5 + $0x10] sm:$0xf] }
 0xbc6   :  { %v1333_v33 = vmul.f32 -1.442695, %v620_v31  ;;  %1440 = vpow2.f32 %v1332_v32 }
 0xbc8   :  { %1442 = vpow2.f32 %v1333_v33 }
 0xbce   :  { %v1439_v30 = vpop.eup %1438 }
 0xbcf   :  { %634 = vrot.lane.b32.xlu0 %v1439_v30, %s1657_s1 }
 0xbd0   :  { %v1441_v2 = vpop.eup %1440 }
 0xbd1   :  { %v615_v36 = vadd.f32 1.0, %v1441_v2 }
 0xbd2   :  { %v1443_v34 = vpop.eup %1442 }
 0xbd3   :  { %v625_v37 = vadd.f32 1.0, %v1443_v34  ;;  %1444 = vrcp.f32 %v615_v36 }
 0xbd5   :  { %1446 = vrcp.f32 %v625_v37 }
 0xbdd   :  { %v1445_v40 = vpop.eup %1444 }
 0xbde   :  { %v665_v19 = vmul.f32 %v1445_v40, %v1833_v18 }
 0xbdf   :  { %v1447_v42 = vpop.eup %1446 }
 0xc36   :  { %v629_v38 = vpop.permute.xlu1 %628 }
 0xc37   :  { %v630_v39 = vrot.slane %v629_v38, 2 }
 0xc39   :  { %1448 = vtanh.f32 %v630_v39 }
 0xc41   :  { %v635_v41 = vpop.permute.xlu0 %634 }
 0xc42   :  { %v637_v43 = vmul.f32 %v1445_v40, %v635_v41 }
 0xc43   :  { %v1449_v45 = vpop.eup %1448 }
 0xc44   :  { %v639_v46 = vmul.f32 %v1764_v35, %v637_v43  ;;  %v638_v47 = vmul.f32 %v1449_v45, %v1447_v42 }
 0xc46   :  { %v640_v48 = vsel %vm63_vm0, %v639_v46, 0.0  ;;  %v645_v49 = vmul.f32 %v1764_v35, %v638_v47 }
 0xc47   :  { %641 = vadd.xlane.f32.xlu1 %v640_v48 }
 0xc48   :  { %v646_v50 = vsel %vm63_vm0, %v645_v49, 0.0 }
 0xc49   :  { %647 = vadd.xlane.f32.xlu0 %v646_v50 }
 0xcd4   :  { %v642_v51 = vpop.xlane.xlu1 %641 }
 0xcd5   :  { %v643_v52 = vadd.f32 %v642_v51, %v1773_v44 }
 0xcd6   :  { %v648_v53 = vpop.xlane.xlu0 %647 }
 0xcd7   :  { %v649_v54 = vadd.f32 %v648_v53, %v1773_v44  ;;  %1450 = vtanh.f32 %v643_v52 }
 0xcd9   :  { %1452 = vtanh.f32 %v649_v54 }
 0xce1   :  { %v1451_v55 = vpop.eup %1450 }
 0xce3   :  { %v1453_v56 = vpop.eup %1452 }
 0xce4   :  { %v651_v57 = vmax.f32 %v1451_v55, %v1453_v56 }
 0xce6   :  { %v652_v58 = vsub.f32 %v1451_v55, %v651_v57  ;;  %v655_v59 = vsub.f32 %v1453_v56, %v651_v57 }
 0xce8   :  { %v653_v60 = vmul.f32 1.442695, %v652_v58  ;;  %v656_v61 = vmul.f32 1.442695, %v655_v59 }
 0xcea   :  { %1454 = vpow2.f32 %v653_v60 }
 0xceb   :  { %1456 = vpow2.f32 %v656_v61 }
 0xcf4   :  { %v1455_v62 = vpop.eup %1454 }
 0xcf5   :  { %v1457_v63 = vpop.eup %1456 }
 0xcf6   :  { %v658_v1 = vadd.f32 %v1457_v63, %v1455_v62 }
 0xcf8   :  { %1458 = vrcp.f32 %v658_v1 }
 0xd02   :  { %v1459_v6 = vpop.eup %1458 }
 0xd03   :  { %v660_v7 = vmul.f32 %v1459_v6, %v1455_v62  ;;  %v662_v8 = vmul.f32 %v1459_v6, %v1457_v63 }
 0xd05   :  { %v661_v9 = vmul.f32 %v660_v7, %v637_v43  ;;  %v663_v11 = vmul.f32 %v662_v8, %v638_v47 }
 0xd07   :  { %v664_v15 = vadd.f32 %v663_v11, %v661_v9 }
 0xd09   :  { %v673_v16 = vrot.slane %v664_v15, %v1758_v14 }
 0xd0b   :  { %674 = vrot.lane.b32.xlu0 %v673_v16, %s1664_s28 }
 0xd7d   :  { %v675_v10 = vpop.permute.xlu0 %674 }
 0xd7e   :  { %v1860_v21 = vadd.f32 %v675_v10, %v665_v19 }
 0xd80   :  { %1460 = vtanh.f32 %v1860_v21 }
 0xd8a   :  { %v1461_v22 = vpop.eup %1460 }
 0xd8b   :  { %680 = vrot.lane.b32.xlu1 %v1461_v22, %s1657_s1 }
 0xdfd   :  { %v681_v12 = vpop.permute.xlu1 %680 }
 0xdfe   :  { %v1864_v23 = vmul.f32 %v1445_v40, %v681_v12 }
 0xe00   :  { %v697_v24 = vpack.c.bf16 %v1864_v23, %v1864_v23 }
 0xe02   :  { %699 = vrot.lane.b32.xlu1 %v697_v24, %s1664_s28 }
 0xe74   :  { %v700_v25 = vpop.permute.xlu1 %699 }
 0xe75   :  { %1334 = vmatmul.mubr.msk.bf16.vlgmr.msra.gmra.mrb[8].mxu0 %vm95_vm1, %v700_v25 }
 0xe76   :  { %999 = vmatpush1.bf16.msra.mxu0 %v1736_v3  ;;  %1030 = vmatprep.mubr.bf16.mxu0 %v1660_v0 }
 0xe77   :  { %1000 = vmatprep.subr.bf16.mxu0 %v1739_v4 }
 0xe7a   :  { %1001 = vmatpush1.bf16.msra.mxu0 %v1743_v5 }
 0xf48   :  { %v738_v18 = vpop.f32.mrb[8].mxu0 }
 0xf49   :  { %v740_v26 = vpop.f32.mrb[9].mxu0 }
 0xf4a   :  { %v749_v27 = vcombine.low %v738_v18, %v740_v26  ;;  %v742_v28 = vpop.f32.mrb[10].mxu0 }
 0xf4b   :  { %v743_v30 = vpop.f32.mrb[11].mxu0 }
 0xf4c   :  { %v756_v31 = vrot.slane %v749_v27, %v1758_v14 }
 0xf4e   :  { %v758_v32 = vadd.f32 %v756_v31, %v746_v29 }
 0xf50   :  { %775 = vrot.lane.b32.xlu0 %v758_v32, %s1663_s2  ;;  %1462 = vtanh.f32 %v758_v32  ;;  %v767_v2 = vrot.slane %v758_v32, 2  ;;  %v1335_v34 = vmul.f32 -1.442695, %v758_v32 }
 0xf52   :  { %v1336_v36 = vmul.f32 -1.442695, %v767_v2  ;;  %1464 = vpow2.f32 %v1335_v34 }
 0xf54   :  { %1466 = vpow2.f32 %v1336_v36 }
 0xf5a   :  { %v1463_v33 = vpop.eup %1462 }
 0xf5b   :  { %781 = vrot.lane.b32.xlu1 %v1463_v33, %s1657_s1  ;;  %v893_v33 = vld [vmem:[#allocation5 + $0x14] sm:$0xf] }
 0xf5c   :  { %v1465_v37 = vpop.eup %1464 }
 0xf5d   :  { %v762_v39 = vadd.f32 1.0, %v1465_v37 }
 0xf5e   :  { %v1467_v38 = vpop.eup %1466 }
 0xf5f   :  { %v772_v40 = vadd.f32 1.0, %v1467_v38  ;;  %1468 = vrcp.f32 %v762_v39 }
 0xf61   :  { %1470 = vrcp.f32 %v772_v40 }
 0xf69   :  { %v1469_v43 = vpop.eup %1468 }
 0xf6a   :  { %v812_v12 = vmul.f32 %v1469_v43, %v1860_v21 }
 0xf6b   :  { %v1471_v46 = vpop.eup %1470 }
 0xfc2   :  { %v776_v41 = vpop.permute.xlu0 %775 }
 0xfc3   :  { %v777_v42 = vrot.slane %v776_v41, 2 }
 0xfc5   :  { %1472 = vtanh.f32 %v777_v42 }
 0xfcd   :  { %v782_v45 = vpop.permute.xlu1 %781 }
 0xfce   :  { %v784_v47 = vmul.f32 %v1469_v43, %v782_v45 }
 0xfcf   :  { %v1473_v48 = vpop.eup %1472 }
 0xfd0   :  { %v786_v49 = vmul.f32 %v1764_v35, %v784_v47  ;;  %v785_v50 = vmul.f32 %v1473_v48, %v1471_v46 }
 0xfd2   :  { %v787_v51 = vsel %vm63_vm0, %v786_v49, 0.0  ;;  %v792_v52 = vmul.f32 %v1764_v35, %v785_v50 }
 0xfd3   :  { %788 = vadd.xlane.f32.xlu0 %v787_v51 }
 0xfd4   :  { %v793_v53 = vsel %vm63_vm0, %v792_v52, 0.0 }
 0xfd5   :  { %794 = vadd.xlane.f32.xlu1 %v793_v53 }
0x1060   :  { %v789_v54 = vpop.xlane.xlu0 %788 }
0x1061   :  { %v790_v55 = vadd.f32 %v789_v54, %v1773_v44 }
0x1062   :  { %v795_v56 = vpop.xlane.xlu1 %794 }
0x1063   :  { %v796_v57 = vadd.f32 %v795_v56, %v1773_v44  ;;  %1474 = vtanh.f32 %v790_v55 }
0x1065   :  { %1476 = vtanh.f32 %v796_v57 }
0x106d   :  { %v1475_v58 = vpop.eup %1474 }
0x106f   :  { %v1477_v59 = vpop.eup %1476 }
0x1070   :  { %v798_v60 = vmax.f32 %v1475_v58, %v1477_v59 }
0x1072   :  { %v799_v61 = vsub.f32 %v1475_v58, %v798_v60  ;;  %v802_v62 = vsub.f32 %v1477_v59, %v798_v60 }
0x1074   :  { %v800_v63 = vmul.f32 1.442695, %v799_v61  ;;  %v803_v1 = vmul.f32 1.442695, %v802_v62 }
0x1076   :  { %1478 = vpow2.f32 %v800_v63 }
0x1077   :  { %1480 = vpow2.f32 %v803_v1 }
0x1080   :  { %v1479_v6 = vpop.eup %1478 }
0x1081   :  { %v1481_v7 = vpop.eup %1480 }
0x1082   :  { %v805_v8 = vadd.f32 %v1481_v7, %v1479_v6 }
0x1084   :  { %1482 = vrcp.f32 %v805_v8 }
0x108e   :  { %v1483_v9 = vpop.eup %1482 }
0x108f   :  { %v807_v11 = vmul.f32 %v1483_v9, %v1479_v6  ;;  %v809_v15 = vmul.f32 %v1483_v9, %v1481_v7 }
0x1091   :  { %v808_v16 = vmul.f32 %v807_v11, %v784_v47  ;;  %v810_v19 = vmul.f32 %v809_v15, %v785_v50 }
0x1093   :  { %v811_v10 = vadd.f32 %v810_v19, %v808_v16 }
0x1095   :  { %v820_v22 = vrot.slane %v811_v10, %v1758_v14 }
0x1097   :  { %821 = vrot.lane.b32.xlu0 %v820_v22, %s1664_s28 }
0x1109   :  { %v822_v24 = vpop.permute.xlu0 %821 }
0x110a   :  { %v1886_v25 = vadd.f32 %v822_v24, %v812_v12 }
0x110c   :  { %1484 = vtanh.f32 %v1886_v25 }
0x1116   :  { %v1485_v18 = vpop.eup %1484 }
0x1117   :  { %827 = vrot.lane.b32.xlu1 %v1485_v18, %s1657_s1 }
0x1189   :  { %v828_v26 = vpop.permute.xlu1 %827 }
0x118a   :  { %v1890_v27 = vmul.f32 %v1469_v43, %v828_v26 }
0x118c   :  { %v844_v28 = vpack.c.bf16 %v1890_v27, %v1890_v27 }
0x118e   :  { %846 = vrot.lane.b32.xlu0 %v844_v28, %s1664_s28 }
0x1200   :  { %v847_v29 = vpop.permute.xlu0 %846 }
0x1201   :  { %1337 = vmatmul.mubr.msk.bf16.vlgmr.msra.gmra.mrb[8].mxu1 %vm95_vm1, %v847_v29 }
0x1202   :  { %1146 = vmatpush1.bf16.msra.mxu1 %v1736_v3  ;;  %1177 = vmatprep.mubr.bf16.mxu1 %v1660_v0 }
0x1203   :  { %1147 = vmatprep.subr.bf16.mxu1 %v1739_v4 }
0x1206   :  { %1148 = vmatpush1.bf16.msra.mxu1 %v1743_v5 }
0x12d4   :  { %v885_v21 = vpop.f32.mrb[8].mxu1 }
0x12d5   :  { %v887_v30 = vpop.f32.mrb[9].mxu1 }
0x12d6   :  { %v896_v31 = vcombine.low %v885_v21, %v887_v30  ;;  %v889_v32 = vpop.f32.mrb[10].mxu1 }
0x12d7   :  { %v890_v2 = vpop.f32.mrb[11].mxu1 }
0x12d8   :  { %v903_v34 = vrot.slane %v896_v31, %v1758_v14  ;;  %v1040_v2 = vld [vmem:[#allocation5 + $0x18] sm:$0xf] }
0x12da   :  { %v905_v36 = vadd.f32 %v903_v34, %v893_v33 }
0x12dc   :  { %922 = vrot.lane.b32.xlu1 %v905_v36, %s1663_s2  ;;  %1486 = vtanh.f32 %v905_v36  ;;  %v914_v0 = vrot.slane %v905_v36, 2  ;;  %v1338_v3 = vmul.f32 -1.442695, %v905_v36 }
0x12de   :  { %v1339_v4 = vmul.f32 -1.442695, %v914_v0  ;;  %1488 = vpow2.f32 %v1338_v3 }
0x12e0   :  { %1490 = vpow2.f32 %v1339_v4 }
0x12e6   :  { %v1487_v37 = vpop.eup %1486 }
0x12e7   :  { %928 = vrot.lane.b32.xlu0 %v1487_v37, %s1657_s1 }
0x12e8   :  { %v1489_v5 = vpop.eup %1488 }
0x12e9   :  { %v909_v39 = vadd.f32 1.0, %v1489_v5 }
0x12ea   :  { %v1491_v38 = vpop.eup %1490 }
0x12eb   :  { %v919_v40 = vadd.f32 1.0, %v1491_v38  ;;  %1492 = vrcp.f32 %v909_v39 }
0x12ed   :  { %1494 = vrcp.f32 %v919_v40 }
0x12f5   :  { %v1493_v43 = vpop.eup %1492 }
0x12f6   :  { %v959_v12 = vmul.f32 %v1493_v43, %v1886_v25 }
0x12f7   :  { %v1495_v46 = vpop.eup %1494 }
0x134e   :  { %v923_v41 = vpop.permute.xlu1 %922 }
0x134f   :  { %v924_v42 = vrot.slane %v923_v41, 2 }
0x1351   :  { %1496 = vtanh.f32 %v924_v42 }
0x1359   :  { %v929_v45 = vpop.permute.xlu0 %928 }
0x135a   :  { %v931_v47 = vmul.f32 %v1493_v43, %v929_v45 }
0x135b   :  { %v1497_v48 = vpop.eup %1496 }
0x135c   :  { %v933_v49 = vmul.f32 %v1764_v35, %v931_v47  ;;  %v932_v50 = vmul.f32 %v1497_v48, %v1495_v46 }
0x135e   :  { %v934_v51 = vsel %vm63_vm0, %v933_v49, 0.0  ;;  %v939_v52 = vmul.f32 %v1764_v35, %v932_v50 }
0x135f   :  { %935 = vadd.xlane.f32.xlu1 %v934_v51 }
0x1360   :  { %v940_v53 = vsel %vm63_vm0, %v939_v52, 0.0 }
0x1361   :  { %941 = vadd.xlane.f32.xlu0 %v940_v53 }
0x13ec   :  { %v936_v54 = vpop.xlane.xlu1 %935 }
0x13ed   :  { %v937_v55 = vadd.f32 %v936_v54, %v1773_v44 }
0x13ee   :  { %v942_v56 = vpop.xlane.xlu0 %941 }
0x13ef   :  { %v943_v57 = vadd.f32 %v942_v56, %v1773_v44  ;;  %1498 = vtanh.f32 %v937_v55 }
0x13f1   :  { %1500 = vtanh.f32 %v943_v57 }
0x13f9   :  { %v1499_v58 = vpop.eup %1498 }
0x13fb   :  { %v1501_v59 = vpop.eup %1500 }
0x13fc   :  { %v945_v60 = vmax.f32 %v1499_v58, %v1501_v59 }
0x13fe   :  { %v946_v61 = vsub.f32 %v1499_v58, %v945_v60  ;;  %v949_v62 = vsub.f32 %v1501_v59, %v945_v60 }
0x1400   :  { %v947_v63 = vmul.f32 1.442695, %v946_v61  ;;  %v950_v1 = vmul.f32 1.442695, %v949_v62 }
0x1402   :  { %1502 = vpow2.f32 %v947_v63 }
0x1403   :  { %1504 = vpow2.f32 %v950_v1 }
0x140c   :  { %v1503_v6 = vpop.eup %1502 }
0x140d   :  { %v1505_v7 = vpop.eup %1504 }
0x140e   :  { %v952_v8 = vadd.f32 %v1505_v7, %v1503_v6 }
0x1410   :  { %1506 = vrcp.f32 %v952_v8 }
0x141a   :  { %v1507_v9 = vpop.eup %1506 }
0x141b   :  { %v954_v11 = vmul.f32 %v1507_v9, %v1503_v6  ;;  %v956_v15 = vmul.f32 %v1507_v9, %v1505_v7 }
0x141d   :  { %v955_v16 = vmul.f32 %v954_v11, %v931_v47  ;;  %v957_v19 = vmul.f32 %v956_v15, %v932_v50 }
0x141f   :  { %v958_v10 = vadd.f32 %v957_v19, %v955_v16 }
0x1421   :  { %v967_v22 = vrot.slane %v958_v10, %v1758_v14 }
0x1423   :  { %968 = vrot.lane.b32.xlu0 %v967_v22, %s1664_s28 }
0x1495   :  { %v969_v24 = vpop.permute.xlu0 %968 }
0x1496   :  { %v1912_v18 = vadd.f32 %v969_v24, %v959_v12 }
0x1498   :  { %1508 = vtanh.f32 %v1912_v18 }
0x14a2   :  { %v1509_v26 = vpop.eup %1508 }
0x14a3   :  { %974 = vrot.lane.b32.xlu1 %v1509_v26, %s1657_s1 }
0x1515   :  { %v975_v28 = vpop.permute.xlu1 %974 }
0x1516   :  { %v1916_v29 = vmul.f32 %v1493_v43, %v975_v28 }
0x1518   :  { %v991_v21 = vpack.c.bf16 %v1916_v29, %v1916_v29 }
0x151a   :  { %993 = vrot.lane.b32.xlu1 %v991_v21, %s1664_s28 }
0x158c   :  { %v994_v30 = vpop.permute.xlu1 %993 }
0x158d   :  { %1340 = vmatmul.mubr.msk.bf16.vlgmr.msra.gmra.mrb[12].mxu0 %vm95_vm1, %v994_v30 }
0x1660   :  { %v1032_v25 = vpop.f32.mrb[12].mxu0 }
0x1661   :  { %v1034_v31 = vpop.f32.mrb[13].mxu0 }
0x1662   :  { %v1043_v32 = vcombine.low %v1032_v25, %v1034_v31  ;;  %v1036_v33 = vpop.f32.mrb[14].mxu0 }
0x1663   :  { %v1037_v34 = vpop.f32.mrb[15].mxu0 }
0x1664   :  { %v1050_v36 = vrot.slane %v1043_v32, %v1758_v14  ;;  %v1187_v34 = vld [vmem:[#allocation5 + $0x1c] sm:$0xf] }
0x1666   :  { %v1052_v37 = vadd.f32 %v1050_v36, %v1040_v2 }
0x1668   :  { %1069 = vrot.lane.b32.xlu0 %v1052_v37, %s1663_s2  ;;  %1510 = vtanh.f32 %v1052_v37  ;;  %v1061_v3 = vrot.slane %v1052_v37, 2  ;;  %v1341_v4 = vmul.f32 -1.442695, %v1052_v37 }
0x166a   :  { %v1342_v5 = vmul.f32 -1.442695, %v1061_v3  ;;  %1512 = vpow2.f32 %v1341_v4 }
0x166c   :  { %1514 = vpow2.f32 %v1342_v5 }
0x1672   :  { %v1511_v0 = vpop.eup %1510 }
0x1673   :  { %1075 = vrot.lane.b32.xlu1 %v1511_v0, %s1657_s1 }
0x1674   :  { %v1513_v38 = vpop.eup %1512 }
0x1675   :  { %v1056_v40 = vadd.f32 1.0, %v1513_v38 }
0x1676   :  { %v1515_v39 = vpop.eup %1514 }
0x1677   :  { %v1066_v41 = vadd.f32 1.0, %v1515_v39  ;;  %1516 = vrcp.f32 %v1056_v40 }
0x1679   :  { %1518 = vrcp.f32 %v1066_v41 }
0x1681   :  { %v1517_v45 = vpop.eup %1516 }
0x1682   :  { %v1106_v12 = vmul.f32 %v1517_v45, %v1912_v18 }
0x1683   :  { %v1519_v47 = vpop.eup %1518 }
0x16da   :  { %v1070_v42 = vpop.permute.xlu0 %1069 }
0x16db   :  { %v1071_v43 = vrot.slane %v1070_v42, 2 }
0x16dd   :  { %1520 = vtanh.f32 %v1071_v43 }
0x16e5   :  { %v1076_v46 = vpop.permute.xlu1 %1075 }
0x16e6   :  { %v1078_v48 = vmul.f32 %v1517_v45, %v1076_v46 }
0x16e7   :  { %v1521_v49 = vpop.eup %1520 }
0x16e8   :  { %v1080_v50 = vmul.f32 %v1764_v35, %v1078_v48  ;;  %v1079_v51 = vmul.f32 %v1521_v49, %v1519_v47 }
0x16ea   :  { %v1081_v52 = vsel %vm63_vm0, %v1080_v50, 0.0  ;;  %v1086_v53 = vmul.f32 %v1764_v35, %v1079_v51 }
0x16eb   :  { %1082 = vadd.xlane.f32.xlu0 %v1081_v52 }
0x16ec   :  { %v1087_v54 = vsel %vm63_vm0, %v1086_v53, 0.0 }
0x16ed   :  { %1088 = vadd.xlane.f32.xlu1 %v1087_v54 }
0x1778   :  { %v1083_v55 = vpop.xlane.xlu0 %1082 }
0x1779   :  { %v1084_v56 = vadd.f32 %v1083_v55, %v1773_v44 }
0x177a   :  { %v1089_v57 = vpop.xlane.xlu1 %1088 }
0x177b   :  { %v1090_v58 = vadd.f32 %v1089_v57, %v1773_v44  ;;  %1522 = vtanh.f32 %v1084_v56 }
0x177d   :  { %1524 = vtanh.f32 %v1090_v58 }
0x1785   :  { %v1523_v59 = vpop.eup %1522 }
0x1787   :  { %v1525_v60 = vpop.eup %1524 }
0x1788   :  { %v1092_v61 = vmax.f32 %v1523_v59, %v1525_v60 }
0x178a   :  { %v1093_v62 = vsub.f32 %v1523_v59, %v1092_v61  ;;  %v1096_v63 = vsub.f32 %v1525_v60, %v1092_v61 }
0x178c   :  { %v1094_v1 = vmul.f32 1.442695, %v1093_v62  ;;  %v1097_v6 = vmul.f32 1.442695, %v1096_v63 }
0x178e   :  { %1526 = vpow2.f32 %v1094_v1 }
0x178f   :  { %1528 = vpow2.f32 %v1097_v6 }
0x1798   :  { %v1527_v35 = vpop.eup %1526 }
0x1799   :  { %v1529_v7 = vpop.eup %1528 }
0x179a   :  { %v1099_v8 = vadd.f32 %v1529_v7, %v1527_v35 }
0x179c   :  { %1530 = vrcp.f32 %v1099_v8 }
0x17a6   :  { %v1531_v9 = vpop.eup %1530 }
0x17a7   :  { %v1101_v11 = vmul.f32 %v1531_v9, %v1527_v35  ;;  %v1103_v15 = vmul.f32 %v1531_v9, %v1529_v7 }
0x17a9   :  { %v1102_v16 = vmul.f32 %v1101_v11, %v1078_v48  ;;  %v1104_v19 = vmul.f32 %v1103_v15, %v1079_v51  ;;  %v1558_v51 = vld [vmem:[#allocation10] ss:$0 sm:$0xff] }
0x17ab   :  { %v1105_v10 = vadd.f32 %v1104_v19, %v1102_v16 }
0x17ad   :  { %v1114_v22 = vrot.slane %v1105_v10, %v1758_v14 }
0x17af   :  { %1115 = vrot.lane.b32.xlu0 %v1114_v22, %s1664_s28 }
0x1821   :  { %v1116_v24 = vpop.permute.xlu0 %1115 }
0x1822   :  { %v1934_v26 = vadd.f32 %v1116_v24, %v1106_v12  ;;  %v397_v24 = vrot.slane %v1810_v17, %v1758_v14 }
0x1824   :  { %1532 = vtanh.f32 %v1934_v26 }
0x182e   :  { %v1533_v28 = vpop.eup %1532 }
0x182f   :  { %1121 = vrot.lane.b32.xlu1 %v1533_v28, %s1657_s1  ;;  %v691_v28 = vrot.slane %v1864_v23, %v1758_v14 }
0x18a1   :  { %v1122_v21 = vpop.permute.xlu1 %1121 }
0x18a2   :  { %v1938_v30 = vmul.f32 %v1517_v45, %v1122_v21  ;;  %v985_v21 = vrot.slane %v1916_v29, %v1758_v14  ;;  %v251_v29 = vrot.slane %v1783_v13, %v1758_v14 }
0x18a4   :  { %v1138_v25 = vpack.c.bf16 %v1938_v30, %v1938_v30 }
0x18a6   :  { %1140 = vrot.lane.b32.xlu0 %v1138_v25, %s1664_s28 }
0x1918   :  { %v1141_v31 = vpop.permute.xlu0 %1140 }
0x1919   :  { %1343 = vmatmul.mubr.msk.bf16.vlgmr.msra.gmra.mrb[12].mxu1 %vm95_vm1, %v1141_v31 }
0x19ec   :  { %v1179_v18 = vpop.f32.mrb[12].mxu1 }
0x19ed   :  { %v1181_v32 = vpop.f32.mrb[13].mxu1 }
0x19ee   :  { %v1190_v33 = vcombine.low %v1179_v18, %v1181_v32  ;;  %v1183_v2 = vpop.f32.mrb[14].mxu1 }
0x19ef   :  { %v1184_v36 = vpop.f32.mrb[15].mxu1  ;;  %v838_v2 = vrot.slane %v1890_v27, %v1758_v14 }
0x19f0   :  { %v1197_v37 = vrot.slane %v1190_v33, %v1758_v14 }
0x19f2   :  { %v1199_v0 = vadd.f32 %v1197_v37, %v1187_v34  ;;  %v1132_v34 = vrot.slane %v1938_v30, %v1758_v14 }
0x19f4   :  { %1216 = vrot.lane.b32.xlu1 %v1199_v0, %s1663_s2  ;;  %1534 = vtanh.f32 %v1199_v0  ;;  %v1208_v4 = vrot.slane %v1199_v0, 2  ;;  %v1344_v5 = vmul.f32 -1.442695, %v1199_v0 }
0x19f6   :  { %v1345_v38 = vmul.f32 -1.442695, %v1208_v4  ;;  %1536 = vpow2.f32 %v1344_v5 }
0x19f8   :  { %1538 = vpow2.f32 %v1345_v38 }
0x19fe   :  { %v1535_v3 = vpop.eup %1534 }
0x19ff   :  { %1222 = vrot.lane.b32.xlu0 %v1535_v3, %s1657_s1 }
0x1a00   :  { %v1537_v39 = vpop.eup %1536 }
0x1a01   :  { %v1203_v41 = vadd.f32 1.0, %v1537_v39 }
0x1a02   :  { %v1539_v40 = vpop.eup %1538 }
0x1a03   :  { %v1213_v42 = vadd.f32 1.0, %v1539_v40  ;;  %1540 = vrcp.f32 %v1203_v41 }
0x1a05   :  { %1542 = vrcp.f32 %v1213_v42 }
0x1a0d   :  { %v1947_v46 = vpop.eup %1540 }
0x1a0e   :  { %v1253_v25 = vmul.f32 %v1947_v46, %v1934_v26  ;;  %v544_v26 = vrot.slane %v1837_v20, %v1758_v14 }
0x1a0f   :  { %v1543_v48 = vpop.eup %1542 }
0x1a66   :  { %v1217_v43 = vpop.permute.xlu1 %1216 }
0x1a67   :  { %v1218_v45 = vrot.slane %v1217_v43, 2 }
0x1a69   :  { %1544 = vtanh.f32 %v1218_v45 }
0x1a71   :  { %v1223_v47 = vpop.permute.xlu0 %1222 }
0x1a72   :  { %v1225_v49 = vmul.f32 %v1947_v46, %v1223_v47 }
0x1a73   :  { %v1545_v50 = vpop.eup %1544 }
0x1a74   :  { %v1227_v52 = vmul.f32 %v1558_v51, %v1225_v49  ;;  %v1226_v53 = vmul.f32 %v1545_v50, %v1543_v48 }
0x1a76   :  { %v1228_v54 = vsel %vm63_vm0, %v1227_v52, 0.0  ;;  %v1233_v55 = vmul.f32 %v1558_v51, %v1226_v53 }
0x1a77   :  { %1229 = vadd.xlane.f32.xlu1 %v1228_v54 }
0x1a78   :  { %v1234_v56 = vsel %vm63_vm0, %v1233_v55, 0.0 }
0x1a79   :  { %1235 = vadd.xlane.f32.xlu0 %v1234_v56 }
0x1b04   :  { %v1230_v57 = vpop.xlane.xlu1 %1229 }
0x1b05   :  { %v1231_v58 = vadd.f32 %v1230_v57, %v1773_v44 }
0x1b06   :  { %v1236_v59 = vpop.xlane.xlu0 %1235 }
0x1b07   :  { %v1237_v60 = vadd.f32 %v1236_v59, %v1773_v44  ;;  %1546 = vtanh.f32 %v1231_v58 }
0x1b09   :  { %1548 = vtanh.f32 %v1237_v60 }
0x1b11   :  { %v1547_v61 = vpop.eup %1546 }
0x1b13   :  { %v1549_v62 = vpop.eup %1548 }
0x1b14   :  { %v1239_v63 = vmax.f32 %v1547_v61, %v1549_v62 }
0x1b16   :  { %v1240_v1 = vsub.f32 %v1547_v61, %v1239_v63  ;;  %v1243_v6 = vsub.f32 %v1549_v62, %v1239_v63 }
0x1b18   :  { %v1241_v35 = vmul.f32 1.442695, %v1240_v1  ;;  %v1244_v7 = vmul.f32 1.442695, %v1243_v6 }
0x1b1a   :  { %1550 = vpow2.f32 %v1241_v35 }
0x1b1b   :  { %1552 = vpow2.f32 %v1244_v7 }
0x1b24   :  { %v1551_v8 = vpop.eup %1550 }
0x1b25   :  { %v1553_v9 = vpop.eup %1552 }
0x1b26   :  { %v1246_v11 = vadd.f32 %v1553_v9, %v1551_v8 }
0x1b28   :  { %1554 = vrcp.f32 %v1246_v11 }
0x1b32   :  { %v1555_v15 = vpop.eup %1554 }
0x1b33   :  { %v1248_v16 = vmul.f32 %v1555_v15, %v1551_v8  ;;  %v1250_v19 = vmul.f32 %v1555_v15, %v1553_v9 }
0x1b35   :  { %v1249_v10 = vmul.f32 %v1248_v16, %v1225_v49  ;;  %v1251_v44 = vmul.f32 %v1250_v19, %v1226_v53 }
0x1b37   :  { %v1252_v22 = vadd.f32 %v1251_v44, %v1249_v10 }
0x1b39   :  { %v1261_v12 = vrot.slane %v1252_v22, %v1758_v14 }
0x1b3b   :  { %1262 = vrot.lane.b32.xlu0 %v1261_v12, %s1664_s28 }
0x1b3f   :  { %398 = vrot.lane.b32.xlu0 %v397_v24, %s1664_s28 }
0x1b43   :  { %692 = vrot.lane.b32.xlu0 %v691_v28, %s1664_s28 }
0x1b47   :  { %986 = vrot.lane.b32.xlu0 %v985_v21, %s1664_s28 }
0x1bad   :  { %v1263_v31 = vpop.permute.xlu0 %1262 }
0x1bae   :  { %v1265_v18 = vadd.f32 %v1263_v31, %v1253_v25 }
0x1bb0   :  { %1556 = vtanh.f32 %v1265_v18  ;;  %v1293_v36 = vrot.slane %v1265_v18, %v1758_v14 }
0x1bb1   :  { %v399_v32 = vpop.permute.xlu0 %398 }
0x1bb2   :  { %402 = vst.msk [vmem:[#allocation11 + $0x2] sm:$0x3] %vm63_vm0, %v399_v32 }
0x1bb5   :  { %v693_v17 = vpop.permute.xlu0 %692 }
0x1bb6   :  { %696 = vst.msk [vmem:[#allocation11 + $0x6] sm:$0x3] %vm63_vm0, %v693_v17 }
0x1bb9   :  { %v987_v23 = vpop.permute.xlu0 %986 }
0x1bba   :  { %v1557_v33 = vpop.eup %1556  ;;  %990 = vst.msk [vmem:[#allocation11 + $0xa] sm:$0x3] %vm63_vm0, %v987_v23 }
0x1bbb   :  { %1268 = vrot.lane.b32.xlu1 %v1557_v33, %s1657_s1 }
0x1bbf   :  { %252 = vrot.lane.b32.xlu1 %v251_v29, %s1664_s28 }
0x1bc3   :  { %545 = vrot.lane.b32.xlu1 %v544_v26, %s1664_s28 }
0x1bc7   :  { %839 = vrot.lane.b32.xlu1 %v838_v2, %s1664_s28 }
0x1bcb   :  { %1133 = vrot.lane.b32.xlu1 %v1132_v34, %s1664_s28 }
0x1bcf   :  { %1294 = vrot.lane.b32.xlu1 %v1293_v36, %s1663_s2 }
0x1c2d   :  { %v1269_v13 = vpop.permute.xlu1 %1268 }
0x1c2e   :  { %v1271_v37 = vmul.f32 %v1947_v46, %v1269_v13 }
0x1c30   :  { %v1279_v20 = vrot.slane %v1271_v37, %v1758_v14 }
0x1c31   :  { %v253_v0 = vpop.permute.xlu1 %252 }
0x1c32   :  { %255 = vst.msk [vmem:[#allocation11] sm:$0x3] %vm63_vm0, %v253_v0  ;;  %1280 = vrot.lane.b32.xlu0 %v1279_v20, %s1664_s28 }
0x1c35   :  { %v546_v27 = vpop.permute.xlu1 %545 }
0x1c36   :  { %549 = vst.msk [vmem:[#allocation11 + $0x4] sm:$0x3] %vm63_vm0, %v546_v27 }
0x1c39   :  { %v840_v30 = vpop.permute.xlu1 %839 }
0x1c3a   :  { %843 = vst.msk [vmem:[#allocation11 + $0x8] sm:$0x3] %vm63_vm0, %v840_v30 }
0x1c3d   :  { %v1134_v3 = vpop.permute.xlu1 %1133 }
0x1c3e   :  { %1137 = vst.msk [vmem:[#allocation11 + $0xc] sm:$0x3] %vm63_vm0, %v1134_v3 }
0x1c41   :  { %v1295_v4 = vpop.permute.xlu1 %1294 }
0x1c42   :  { %1297 = vst.msk [vmem:[#allocation3] sm:$0x3] %vm63_vm0, %v1295_v4 }
0x1ca4   :  { %v1281_v14 = vpop.permute.xlu0 %1280 }
0x1ca5   :  { %1284 = vst.msk [vmem:[#allocation11 + $0xe] sm:$0x3] %vm63_vm0, %v1281_v14  ;;  %1285 = vst.msk [vmem:[#allocation2] sm:$0x3] %vm63_vm0, %v1281_v14 }
0x1ca6   :  { %1636 = shalt.err (!%p1633_p0)
}
0x1ca7   :  { %s1637_s9 = scalar_lea.hbm %s2013_s4, 256 }
0x1ca8   :  { %p1638_p1 = scmp.ne.s32.totalorder %s2013_s4, %s1637_s9  ;;  %p1641_p2 = scmp.lt.u32.totalorder %s1637_s9, %s2013_s4 }
0x1caa   :  { %p1643_p3 = pnand %p1641_p2, %p1638_p1 }
0x1cac   :  { %1646 = shalt.err (!%p1643_p3)
}
0x1cad   :  { %s1666_s13 = smov 2  }
0x1cae   :  { %1309 = dma.vmem_to_hbm [thread:$0]  %s1304_s5, 256, %s2013_s4, [#allocation7], %s1664_s28, %s1664_s28, %s1666_s13  }
0x1caf   :  { %1651 = dma.done.wait [#allocation7], 256  }
0x1cb0   :  { %1652 = vsyncadd [#allocation7], 4294967040 }
0x1cb1   :  { %1313 = vsyncpa [#allocation6], 1 }
0x1cb2   :  { %1314 = vsyncpa [#allocation9], 1 }
0x1cb3   :  { %1315 = vsyncpa [#allocation7], 1 }

</bundles_post_ra>
